<compile_context>
chip_gen: v6e
topology: v6e:2x2x1
jax: 0.10.0
libtpu: 0.0.40
codegen_flags: <defaults>
</compile_context>

<pallas_src>
import functools
import math

import jax
import jax.numpy as jnp
from jax import lax
from jax.experimental import pallas as pl
from jax.experimental.pallas import tpu as pltpu


def _round_up(x, m):
    return ((x + m - 1) // m) * m


# ---------------------------------------------------------------------------
# Fused Pallas kernel: embedded inputs -> L RNN(tanh) layers -> FC logits
# ---------------------------------------------------------------------------
def _fused_rnn_kernel(*refs, num_layers, T, Bs, Hp, n_proj, unroll):
    # refs layout:
    #   [0]                x_ref   (T*Bs, Dp) bf16   time-major padded inputs
    #   [1 .. 3L]          per layer: wih_t (Din_p, Hp) bf16,
    #                                 whh_t (Hp, Hp)    bf16,
    #                                 bias  (1, Hp)     f32 (b_ih + b_hh)
    #   [3L+1], [3L+2]     fcw_ref (Hp, Op) bf16, fcb_ref (1, Op) f32
    #   [3L+3]             out_ref (Bs, Op) f32
    #   [3L+4 ..]          n_proj VMEM scratch buffers (T*Bs, Hp) f32
    x_ref = refs[0]
    w_refs = refs[1:1 + 3 * num_layers]
    fcw_ref = refs[1 + 3 * num_layers]
    fcb_ref = refs[2 + 3 * num_layers]
    out_ref = refs[3 + 3 * num_layers]
    proj_bufs = refs[4 + 3 * num_layers:4 + 3 * num_layers + n_proj]

    # Layer 0: hoisted input projection for ALL time steps at once — a single
    # large bf16 MXU matmul (f32 accumulate) with the folded bias added.
    proj_bufs[0][...] = (
        jnp.dot(x_ref[...], w_refs[0][...], preferred_element_type=jnp.float32)
        + w_refs[2][...]
    )

    h_last = jnp.zeros((Bs, Hp), jnp.float32)
    for l in range(num_layers):
        cur = proj_bufs[l % n_proj]
        nxt = proj_bufs[(l + 1) % n_proj]
        is_last = l == num_layers - 1

        # Hoisted out of the serial loop: recurrent weight (bf16) and, for
        # non-final layers, the NEXT layer's input weight/bias so its
        # projection can be interleaved with this layer's recurrence.
        whh = w_refs[3 * l + 1][...]
        # TODO(synk): pin W_hh in the MXU weight registers across the serial
        # loop via pltpu.matmul_push_rhs / matmul_acc_lhs / matmul_pop to
        # avoid re-loading the systolic array every step.
        if not is_last:
            wih_next = w_refs[3 * (l + 1)][...]
            b_next = w_refs[3 * (l + 1) + 2][...]

        def step(t, h):
            off = pl.multiple_of(t * Bs, Bs)
            p_t = cur[pl.ds(off, Bs), :]
            # Serial critical path: (Bs,Hp)@(Hp,Hp) bf16 matmul -> add -> tanh.
            h_new = jnp.tanh(
                p_t + jnp.dot(h.astype(jnp.bfloat16), whh,
                              preferred_element_type=jnp.float32))
            if not is_last:
                # Interleave the NEXT layer's (parallel) input projection with
                # this layer's latency-bound recurrence: fills otherwise idle
                # MXU slots and removes the separate `seq` scratch buffer.
                nxt[pl.ds(off, Bs), :] = (
                    jnp.dot(h_new.astype(jnp.bfloat16), wih_next,
                            preferred_element_type=jnp.float32) + b_next)
            return h_new

        h_last = lax.fori_loop(0, T, step,
                               jnp.zeros((Bs, Hp), jnp.float32),
                               unroll=unroll)

    # Fused FC head on the final hidden state.
    # TODO(synk): nn.Dropout(p=0.3) is active only in training; eval=identity.
    out_ref[...] = (
        jnp.dot(h_last.astype(jnp.bfloat16), fcw_ref[...],
                preferred_element_type=jnp.float32)
        + fcb_ref[...]
    ).astype(out_ref.dtype)


# ---------------------------------------------------------------------------
# One-time parameter prep: transpose, fold biases, pad to (8,128), cast bf16
# ---------------------------------------------------------------------------
def prepare_params(params):
    emb = params["embedding"]
    V, D = emb.shape
    H = params["rnn_layers"][0][1].shape[0]
    O = params["fc_w"].shape[0]
    Dp, Hp, Op = _round_up(D, 128), _round_up(H, 128), _round_up(O, 128)

    def pad2(a, rows, cols):
        r, c = a.shape
        return jnp.pad(a, ((0, rows - r), (0, cols - c)))

    # Embedding table padded lane-dense + one trailing all-zero row used by
    # padded batch slots; stored bf16 (MXU operand dtype).
    emb_p = pad2(emb, V + 1, Dp).astype(jnp.bfloat16)

    layers = []
    for l, (w_ih, w_hh, b_ih, b_hh) in enumerate(params["rnn_layers"]):
        in_p = Dp if l == 0 else Hp
        wih_t = pad2(jnp.transpose(w_ih), in_p, Hp).astype(jnp.bfloat16)
        whh_t = pad2(jnp.transpose(w_hh), Hp, Hp).astype(jnp.bfloat16)
        bias = pad2((b_ih + b_hh).reshape(1, H), 1, Hp)            # f32
        layers.append((wih_t, whh_t, bias))

    fc_wt = pad2(jnp.transpose(params["fc_w"]), Hp, Op).astype(jnp.bfloat16)
    fc_b = pad2(params["fc_b"].reshape(1, O), 1, Op)               # f32
    return {
        "emb_p": emb_p,
        "layers": layers,
        "fc_wt": fc_wt,
        "fc_b": fc_b,
        "voc_size": V,
        "dims": (D, H, O, Dp, Hp, Op),
    }


# ---------------------------------------------------------------------------
# Forward pass
# ---------------------------------------------------------------------------
def rnn_forward(prep, ids, num_shards=None):
    """ids: int32 (B, T) token indices -> logits (B, output_size). Eval mode."""
    B, T = ids.shape
    D, H, O, Dp, Hp, Op = prep["dims"]
    Bp = _round_up(B, 8)

    if num_shards is None:
        # One batch shard per TensorCore on v7x (2 TCs); only shard when the
        # padded batch splits into >=8-row slabs. v5e/v6e iterate shards
        # serially (same weights block -> no re-DMA, negligible overhead).
        num_shards = 2 if (Bp % 16 == 0 and Bp >= 16) else 1
    Bs = Bp // num_shards

    num_layers = len(prep["layers"])
    n_proj = 2 if num_layers > 1 else 1
    V = prep["voc_size"]

    # Embedding lookup as ONE gather emitted directly in the kernel layout:
    # (shard, time-major, batch-padded via zero row, lane-dense, bf16).
    ids_p = jnp.pad(ids.astype(jnp.int32), ((0, Bp - B), (0, 0)),
                    constant_values=V)                      # (Bp, T)
    ids_p = ids_p.reshape(num_shards, Bs, T).transpose(0, 2, 1)   # (S, T, Bs)
    x = jnp.take(prep["emb_p"], ids_p.reshape(num_shards * T * Bs), axis=0)
    x = x.reshape(num_shards, T * Bs, Dp)                   # bf16

    flat_weights = []
    for trio in prep["layers"]:
        flat_weights.extend(trio)

    def whole_spec(a):
        nd = a.ndim

        def imap(s):
            return (0,) * nd

        return pl.BlockSpec(a.shape, imap)

    in_specs = [pl.BlockSpec((None, T * Bs, Dp), lambda s: (s, 0, 0))]
    in_specs += [whole_spec(w) for w in flat_weights]
    in_specs += [whole_spec(prep["fc_wt"]), whole_spec(prep["fc_b"])]
    out_spec = pl.BlockSpec((None, Bs, Op), lambda s: (s, 0, 0))

    scratch_shapes = [pltpu.VMEM((T * Bs, Hp), jnp.float32)
                      for _ in range(n_proj)]

    # Explicit VMEM budget (default scoped limits are only 16/32/32 MiB on
    # v5e/v6e/v7x): double-buffered blocks + resident weights + proj scratch.
    def nbytes(a):
        return int(a.size) * a.dtype.itemsize

    weight_bytes = sum(nbytes(w) for w in flat_weights)
    weight_bytes += nbytes(prep["fc_wt"]) + nbytes(prep["fc_b"])
    vmem_limit = min(
        2 * (T * Bs * Dp * 2 + Bs * Op * 4) + 2 * weight_bytes
        + n_proj * T * Bs * Hp * 4 + (2 << 20),
        128 * 1024 * 1024,
    )
    # TODO(synk): for large T on v7x (64 MiB VMEM), stream x / proj in T-chunks
    # and double-buffer per-layer weights via manual make_async_copy instead of
    # keeping everything resident.

    kernel = functools.partial(
        _fused_rnn_kernel, num_layers=num_layers, T=T, Bs=Bs, Hp=Hp,
        n_proj=n_proj, unroll=min(8, T))

    out = pl.pallas_call(
        kernel,
        out_shape=jax.ShapeDtypeStruct((num_shards, Bs, Op), jnp.float32),
        grid_spec=pltpu.PrefetchScalarGridSpec(
            num_scalar_prefetch=0,
            grid=(num_shards,),
            in_specs=in_specs,
            out_specs=out_spec,
            scratch_shapes=scratch_shapes),
        compiler_params=pltpu.CompilerParams(
            dimension_semantics=("parallel",),
            vmem_limit_bytes=int(vmem_limit)),
    )(x, *flat_weights, prep["fc_wt"], prep["fc_b"])

    return out.reshape(Bp, Op)[:B, :O]


# ---------------------------------------------------------------------------
# Deterministic parameter construction (mirrors RNN.__init__ shapes/init)
# ---------------------------------------------------------------------------
def xavier_uniform(key, shape):
    fan_out, fan_in = shape
    bound = math.sqrt(6.0 / (fan_in + fan_out))
    return jax.random.uniform(key, shape, jnp.float32, -bound, bound)


def init_params(key, voc_size, input_size, hidden_size, output_size, layers):
    keys = jax.random.split(key, 2 + 2 * layers)
    params = {}
    params["embedding"] = jax.random.normal(
        keys[0], (voc_size, input_size), jnp.float32)

    rnn_layers = []
    for l in range(layers):
        in_sz = input_size if l == 0 else hidden_size
        w_ih = xavier_uniform(keys[1 + 2 * l], (hidden_size, in_sz))
        w_hh = xavier_uniform(keys[2 + 2 * l], (hidden_size, hidden_size))
        b_ih = jnp.zeros((hidden_size,), jnp.float32)
        b_hh = jnp.zeros((hidden_size,), jnp.float32)
        rnn_layers.append((w_ih, w_hh, b_ih, b_hh))
    params["rnn_layers"] = rnn_layers

    bound = 1.0 / math.sqrt(hidden_size)
    params["fc_w"] = jax.random.uniform(
        keys[-1], (output_size, hidden_size), jnp.float32, -bound, bound)
    params["fc_b"] = jnp.zeros((output_size,), jnp.float32)
    return params


# ---------------------------------------------------------------------------
# Reference (pure JAX, f32) for a sanity check
# ---------------------------------------------------------------------------
def rnn_forward_ref(params, ids):
    x = jnp.take(params["embedding"], ids, axis=0).astype(jnp.float32)  # (B,T,D)
    B, T, _ = x.shape
    for (w_ih, w_hh, b_ih, b_hh) in params["rnn_layers"]:
        H = w_hh.shape[0]
        h = jnp.zeros((B, H), jnp.float32)
        outs = []
        for t in range(T):
            h = jnp.tanh(x[:, t] @ w_ih.T + b_ih + h @ w_hh.T + b_hh)
            outs.append(h)
        x = jnp.stack(outs, axis=1)
    last = x[:, -1, :]
    return last @ params["fc_w"].T + params["fc_b"]


# ---------------------------------------------------------------------------
if __name__ == "__main__":
    voc_size, input_size, hidden_size, output_size, layers = 50, 32, 32, 4, 2
    batch, seq = 2, 8

    key = jax.random.PRNGKey(0)
    pkey, dkey = jax.random.split(key)
    params = init_params(pkey, voc_size, input_size, hidden_size,
                         output_size, layers)
    ids = jax.random.randint(dkey, (batch, seq), 0, voc_size, dtype=jnp.int32)

    prep = prepare_params(params)  # one-time transpose/pad/bf16, NOT per call

    out = jax.block_until_ready(rnn_forward(prep, ids))
    ref = jax.block_until_ready(rnn_forward_ref(params, ids))

    assert out.shape == (batch, output_size), out.shape
    # bf16 MXU operands (f32 accumulation) vs the pure-f32 reference.
    assert jnp.allclose(out, ref, atol=5e-2, rtol=5e-2), (out, ref)
    print("KERNEL_OK")
</pallas_src>

<mosaic_0001>
module attributes {stable_mosaic.version = 11 : i64} {
  func.func @_fused_rnn_kernel(%arg0: i32, %arg1: memref<1x64x128xbf16, #tpu.memory_space<vmem>>, %arg2: memref<128x128xbf16, #tpu.memory_space<vmem>>, %arg3: memref<128x128xbf16, #tpu.memory_space<vmem>>, %arg4: memref<1x128xf32, #tpu.memory_space<vmem>>, %arg5: memref<128x128xbf16, #tpu.memory_space<vmem>>, %arg6: memref<128x128xbf16, #tpu.memory_space<vmem>>, %arg7: memref<1x128xf32, #tpu.memory_space<vmem>>, %arg8: memref<128x128xbf16, #tpu.memory_space<vmem>>, %arg9: memref<1x128xf32, #tpu.memory_space<vmem>>, %arg10: memref<1x8x128xf32, #tpu.memory_space<vmem>>, %arg11: memref<64x128xf32, #tpu.memory_space<vmem>>, %arg12: memref<64x128xf32, #tpu.memory_space<vmem>>) attributes {dimension_semantics = [#tpu.dimension_semantics<parallel>], iteration_bounds = array<i64: 1>, scalar_prefetch = 0 : i64, scratch_operands = 2 : i64, tpu.core_type = #tpu.core_type<tc>, window_params = [{transform_indices = @transform_0, window_bounds = array<i64: 1, 64, 128>}, {pipeline_mode = #tpu.pipeline_mode<synchronous>, transform_indices = @transform_1, window_bounds = array<i64: 128, 128>}, {pipeline_mode = #tpu.pipeline_mode<synchronous>, transform_indices = @transform_2, window_bounds = array<i64: 128, 128>}, {pipeline_mode = #tpu.pipeline_mode<synchronous>, transform_indices = @transform_3, window_bounds = array<i64: 1, 128>}, {pipeline_mode = #tpu.pipeline_mode<synchronous>, transform_indices = @transform_4, window_bounds = array<i64: 128, 128>}, {pipeline_mode = #tpu.pipeline_mode<synchronous>, transform_indices = @transform_5, window_bounds = array<i64: 128, 128>}, {pipeline_mode = #tpu.pipeline_mode<synchronous>, transform_indices = @transform_6, window_bounds = array<i64: 1, 128>}, {pipeline_mode = #tpu.pipeline_mode<synchronous>, transform_indices = @transform_7, window_bounds = array<i64: 128, 128>}, {pipeline_mode = #tpu.pipeline_mode<synchronous>, transform_indices = @transform_8, window_bounds = array<i64: 1, 128>}, {transform_indices = @transform_9, window_bounds = array<i64: 1, 8, 128>}]} {
    %c0 = arith.constant 0 : index
    %c0_0 = arith.constant 0 : index
    %c0_1 = arith.constant 0 : index
    %0 = vector.load %arg1[%c0, %c0_0, %c0_1] : memref<1x64x128xbf16, #tpu.memory_space<vmem>>, vector<1x64x128xbf16>
    %1 = vector.shape_cast %0 : vector<1x64x128xbf16> to vector<64x128xbf16>
    %c0_2 = arith.constant 0 : index
    %c0_3 = arith.constant 0 : index
    %2 = vector.load %arg2[%c0_2, %c0_3] : memref<128x128xbf16, #tpu.memory_space<vmem>>, vector<128x128xbf16>
    %cst = arith.constant dense<0.000000e+00> : vector<64x128xf32>
    %3 = tpu.matmul %1, %2, %cst {dimension_numbers = #tpu.dot_dimension_numbers<[1], [0], [0], [1], [0, 0, 1, 1], [], []>} : vector<64x128xbf16>, vector<128x128xbf16>, vector<64x128xf32> -> vector<64x128xf32>
    %c0_4 = arith.constant 0 : index
    %c0_5 = arith.constant 0 : index
    %4 = vector.load %arg4[%c0_4, %c0_5] : memref<1x128xf32, #tpu.memory_space<vmem>>, vector<1x128xf32>
    %5 = vector.broadcast %4 : vector<1x128xf32> to vector<64x128xf32>
    %6 = arith.addf %3, %5 : vector<64x128xf32>
    %c0_6 = arith.constant 0 : index
    %c0_7 = arith.constant 0 : index
    %7 = vector.load %arg11[%c0_6, %c0_7] : memref<64x128xf32, #tpu.memory_space<vmem>>, vector<64x128xf32>
    tpu.vector_store %arg11[%c0_6, %c0_7], %6 {strides = array<i32>} : memref<64x128xf32, #tpu.memory_space<vmem>>, vector<64x128xf32>,
    %c0_8 = arith.constant 0 : index
    %c0_9 = arith.constant 0 : index
    %8 = vector.load %arg3[%c0_8, %c0_9] : memref<128x128xbf16, #tpu.memory_space<vmem>>, vector<128x128xbf16>
    %c0_10 = arith.constant 0 : index
    %c0_11 = arith.constant 0 : index
    %9 = vector.load %arg5[%c0_10, %c0_11] : memref<128x128xbf16, #tpu.memory_space<vmem>>, vector<128x128xbf16>
    %c0_12 = arith.constant 0 : index
    %c0_13 = arith.constant 0 : index
    %10 = vector.load %arg7[%c0_12, %c0_13] : memref<1x128xf32, #tpu.memory_space<vmem>>, vector<1x128xf32>
    %cst_14 = arith.constant 0.000000e+00 : f32
    %11 = vector.broadcast %cst_14 : f32 to vector<8x128xf32>
    %c0_i32 = arith.constant 0 : i32
    %c8_i32 = arith.constant 8 : i32
    %12 = arith.muli %c0_i32, %c8_i32 : i32
    %13 = tpu.assume_multiple %12, 8 : i32
    %14 = arith.index_cast %13 : i32 to index
    %c0_15 = arith.constant 0 : index
    %15 = vector.load %arg11[%14, %c0_15] : memref<64x128xf32, #tpu.memory_space<vmem>>, vector<8x128xf32>
    %16 = arith.truncf %11 : vector<8x128xf32> to vector<8x128xbf16>
    %cst_16 = arith.constant dense<0.000000e+00> : vector<8x128xf32>
    %17 = tpu.matmul %16, %8, %cst_16 {dimension_numbers = #tpu.dot_dimension_numbers<[1], [0], [0], [1], [0, 0, 1, 1], [], []>} : vector<8x128xbf16>, vector<128x128xbf16>, vector<8x128xf32> -> vector<8x128xf32>
    %18 = arith.addf %15, %17 : vector<8x128xf32>
    %19 = math.tanh %18 : vector<8x128xf32>
    %20 = arith.truncf %19 : vector<8x128xf32> to vector<8x128xbf16>
    %cst_17 = arith.constant dense<0.000000e+00> : vector<8x128xf32>
    %21 = tpu.matmul %20, %9, %cst_17 {dimension_numbers = #tpu.dot_dimension_numbers<[1], [0], [0], [1], [0, 0, 1, 1], [], []>} : vector<8x128xbf16>, vector<128x128xbf16>, vector<8x128xf32> -> vector<8x128xf32>
    %22 = vector.broadcast %10 : vector<1x128xf32> to vector<8x128xf32>
    %23 = arith.addf %21, %22 : vector<8x128xf32>
    %24 = arith.index_cast %13 : i32 to index
    %c0_18 = arith.constant 0 : index
    %25 = vector.load %arg12[%24, %c0_18] : memref<64x128xf32, #tpu.memory_space<vmem>>, vector<8x128xf32>
    tpu.vector_store %arg12[%24, %c0_18], %23 {strides = array<i32>} : memref<64x128xf32, #tpu.memory_space<vmem>>, vector<8x128xf32>,
    %c1_i32 = arith.constant 1 : i32
    %c8_i32_19 = arith.constant 8 : i32
    %26 = arith.muli %c1_i32, %c8_i32_19 : i32
    %27 = tpu.assume_multiple %26, 8 : i32
    %28 = arith.index_cast %27 : i32 to index
    %c0_20 = arith.constant 0 : index
    %29 = vector.load %arg11[%28, %c0_20] : memref<64x128xf32, #tpu.memory_space<vmem>>, vector<8x128xf32>
    %30 = arith.truncf %19 : vector<8x128xf32> to vector<8x128xbf16>
    %cst_21 = arith.constant dense<0.000000e+00> : vector<8x128xf32>
    %31 = tpu.matmul %30, %8, %cst_21 {dimension_numbers = #tpu.dot_dimension_numbers<[1], [0], [0], [1], [0, 0, 1, 1], [], []>} : vector<8x128xbf16>, vector<128x128xbf16>, vector<8x128xf32> -> vector<8x128xf32>
    %32 = arith.addf %29, %31 : vector<8x128xf32>
    %33 = math.tanh %32 : vector<8x128xf32>
    %34 = arith.truncf %33 : vector<8x128xf32> to vector<8x128xbf16>
    %cst_22 = arith.constant dense<0.000000e+00> : vector<8x128xf32>
    %35 = tpu.matmul %34, %9, %cst_22 {dimension_numbers = #tpu.dot_dimension_numbers<[1], [0], [0], [1], [0, 0, 1, 1], [], []>} : vector<8x128xbf16>, vector<128x128xbf16>, vector<8x128xf32> -> vector<8x128xf32>
    %36 = vector.broadcast %10 : vector<1x128xf32> to vector<8x128xf32>
    %37 = arith.addf %35, %36 : vector<8x128xf32>
    %38 = arith.index_cast %27 : i32 to index
    %c0_23 = arith.constant 0 : index
    %39 = vector.load %arg12[%38, %c0_23] : memref<64x128xf32, #tpu.memory_space<vmem>>, vector<8x128xf32>
    tpu.vector_store %arg12[%38, %c0_23], %37 {strides = array<i32>} : memref<64x128xf32, #tpu.memory_space<vmem>>, vector<8x128xf32>,
    %c2_i32 = arith.constant 2 : i32
    %c8_i32_24 = arith.constant 8 : i32
    %40 = arith.muli %c2_i32, %c8_i32_24 : i32
    %41 = tpu.assume_multiple %40, 8 : i32
    %42 = arith.index_cast %41 : i32 to index
    %c0_25 = arith.constant 0 : index
    %43 = vector.load %arg11[%42, %c0_25] : memref<64x128xf32, #tpu.memory_space<vmem>>, vector<8x128xf32>
    %44 = arith.truncf %33 : vector<8x128xf32> to vector<8x128xbf16>
    %cst_26 = arith.constant dense<0.000000e+00> : vector<8x128xf32>
    %45 = tpu.matmul %44, %8, %cst_26 {dimension_numbers = #tpu.dot_dimension_numbers<[1], [0], [0], [1], [0, 0, 1, 1], [], []>} : vector<8x128xbf16>, vector<128x128xbf16>, vector<8x128xf32> -> vector<8x128xf32>
    %46 = arith.addf %43, %45 : vector<8x128xf32>
    %47 = math.tanh %46 : vector<8x128xf32>
    %48 = arith.truncf %47 : vector<8x128xf32> to vector<8x128xbf16>
    %cst_27 = arith.constant dense<0.000000e+00> : vector<8x128xf32>
    %49 = tpu.matmul %48, %9, %cst_27 {dimension_numbers = #tpu.dot_dimension_numbers<[1], [0], [0], [1], [0, 0, 1, 1], [], []>} : vector<8x128xbf16>, vector<128x128xbf16>, vector<8x128xf32> -> vector<8x128xf32>
    %50 = vector.broadcast %10 : vector<1x128xf32> to vector<8x128xf32>
    %51 = arith.addf %49, %50 : vector<8x128xf32>
    %52 = arith.index_cast %41 : i32 to index
    %c0_28 = arith.constant 0 : index
    %53 = vector.load %arg12[%52, %c0_28] : memref<64x128xf32, #tpu.memory_space<vmem>>, vector<8x128xf32>
    tpu.vector_store %arg12[%52, %c0_28], %51 {strides = array<i32>} : memref<64x128xf32, #tpu.memory_space<vmem>>, vector<8x128xf32>,
    %c3_i32 = arith.constant 3 : i32
    %c8_i32_29 = arith.constant 8 : i32
    %54 = arith.muli %c3_i32, %c8_i32_29 : i32
    %55 = tpu.assume_multiple %54, 8 : i32
    %56 = arith.index_cast %55 : i32 to index
    %c0_30 = arith.constant 0 : index
    %57 = vector.load %arg11[%56, %c0_30] : memref<64x128xf32, #tpu.memory_space<vmem>>, vector<8x128xf32>
    %58 = arith.truncf %47 : vector<8x128xf32> to vector<8x128xbf16>
    %cst_31 = arith.constant dense<0.000000e+00> : vector<8x128xf32>
    %59 = tpu.matmul %58, %8, %cst_31 {dimension_numbers = #tpu.dot_dimension_numbers<[1], [0], [0], [1], [0, 0, 1, 1], [], []>} : vector<8x128xbf16>, vector<128x128xbf16>, vector<8x128xf32> -> vector<8x128xf32>
    %60 = arith.addf %57, %59 : vector<8x128xf32>
    %61 = math.tanh %60 : vector<8x128xf32>
    %62 = arith.truncf %61 : vector<8x128xf32> to vector<8x128xbf16>
    %cst_32 = arith.constant dense<0.000000e+00> : vector<8x128xf32>
    %63 = tpu.matmul %62, %9, %cst_32 {dimension_numbers = #tpu.dot_dimension_numbers<[1], [0], [0], [1], [0, 0, 1, 1], [], []>} : vector<8x128xbf16>, vector<128x128xbf16>, vector<8x128xf32> -> vector<8x128xf32>
    %64 = vector.broadcast %10 : vector<1x128xf32> to vector<8x128xf32>
    %65 = arith.addf %63, %64 : vector<8x128xf32>
    %66 = arith.index_cast %55 : i32 to index
    %c0_33 = arith.constant 0 : index
    %67 = vector.load %arg12[%66, %c0_33] : memref<64x128xf32, #tpu.memory_space<vmem>>, vector<8x128xf32>
    tpu.vector_store %arg12[%66, %c0_33], %65 {strides = array<i32>} : memref<64x128xf32, #tpu.memory_space<vmem>>, vector<8x128xf32>,
    %c4_i32 = arith.constant 4 : i32
    %c8_i32_34 = arith.constant 8 : i32
    %68 = arith.muli %c4_i32, %c8_i32_34 : i32
    %69 = tpu.assume_multiple %68, 8 : i32
    %70 = arith.index_cast %69 : i32 to index
    %c0_35 = arith.constant 0 : index
    %71 = vector.load %arg11[%70, %c0_35] : memref<64x128xf32, #tpu.memory_space<vmem>>, vector<8x128xf32>
    %72 = arith.truncf %61 : vector<8x128xf32> to vector<8x128xbf16>
    %cst_36 = arith.constant dense<0.000000e+00> : vector<8x128xf32>
    %73 = tpu.matmul %72, %8, %cst_36 {dimension_numbers = #tpu.dot_dimension_numbers<[1], [0], [0], [1], [0, 0, 1, 1], [], []>} : vector<8x128xbf16>, vector<128x128xbf16>, vector<8x128xf32> -> vector<8x128xf32>
    %74 = arith.addf %71, %73 : vector<8x128xf32>
    %75 = math.tanh %74 : vector<8x128xf32>
    %76 = arith.truncf %75 : vector<8x128xf32> to vector<8x128xbf16>
    %cst_37 = arith.constant dense<0.000000e+00> : vector<8x128xf32>
    %77 = tpu.matmul %76, %9, %cst_37 {dimension_numbers = #tpu.dot_dimension_numbers<[1], [0], [0], [1], [0, 0, 1, 1], [], []>} : vector<8x128xbf16>, vector<128x128xbf16>, vector<8x128xf32> -> vector<8x128xf32>
    %78 = vector.broadcast %10 : vector<1x128xf32> to vector<8x128xf32>
    %79 = arith.addf %77, %78 : vector<8x128xf32>
    %80 = arith.index_cast %69 : i32 to index
    %c0_38 = arith.constant 0 : index
    %81 = vector.load %arg12[%80, %c0_38] : memref<64x128xf32, #tpu.memory_space<vmem>>, vector<8x128xf32>
    tpu.vector_store %arg12[%80, %c0_38], %79 {strides = array<i32>} : memref<64x128xf32, #tpu.memory_space<vmem>>, vector<8x128xf32>,
    %c5_i32 = arith.constant 5 : i32
    %c8_i32_39 = arith.constant 8 : i32
    %82 = arith.muli %c5_i32, %c8_i32_39 : i32
    %83 = tpu.assume_multiple %82, 8 : i32
    %84 = arith.index_cast %83 : i32 to index
    %c0_40 = arith.constant 0 : index
    %85 = vector.load %arg11[%84, %c0_40] : memref<64x128xf32, #tpu.memory_space<vmem>>, vector<8x128xf32>
    %86 = arith.truncf %75 : vector<8x128xf32> to vector<8x128xbf16>
    %cst_41 = arith.constant dense<0.000000e+00> : vector<8x128xf32>
    %87 = tpu.matmul %86, %8, %cst_41 {dimension_numbers = #tpu.dot_dimension_numbers<[1], [0], [0], [1], [0, 0, 1, 1], [], []>} : vector<8x128xbf16>, vector<128x128xbf16>, vector<8x128xf32> -> vector<8x128xf32>
    %88 = arith.addf %85, %87 : vector<8x128xf32>
    %89 = math.tanh %88 : vector<8x128xf32>
    %90 = arith.truncf %89 : vector<8x128xf32> to vector<8x128xbf16>
    %cst_42 = arith.constant dense<0.000000e+00> : vector<8x128xf32>
    %91 = tpu.matmul %90, %9, %cst_42 {dimension_numbers = #tpu.dot_dimension_numbers<[1], [0], [0], [1], [0, 0, 1, 1], [], []>} : vector<8x128xbf16>, vector<128x128xbf16>, vector<8x128xf32> -> vector<8x128xf32>
    %92 = vector.broadcast %10 : vector<1x128xf32> to vector<8x128xf32>
    %93 = arith.addf %91, %92 : vector<8x128xf32>
    %94 = arith.index_cast %83 : i32 to index
    %c0_43 = arith.constant 0 : index
    %95 = vector.load %arg12[%94, %c0_43] : memref<64x128xf32, #tpu.memory_space<vmem>>, vector<8x128xf32>
    tpu.vector_store %arg12[%94, %c0_43], %93 {strides = array<i32>} : memref<64x128xf32, #tpu.memory_space<vmem>>, vector<8x128xf32>,
    %c6_i32 = arith.constant 6 : i32
    %c8_i32_44 = arith.constant 8 : i32
    %96 = arith.muli %c6_i32, %c8_i32_44 : i32
    %97 = tpu.assume_multiple %96, 8 : i32
    %98 = arith.index_cast %97 : i32 to index
    %c0_45 = arith.constant 0 : index
    %99 = vector.load %arg11[%98, %c0_45] : memref<64x128xf32, #tpu.memory_space<vmem>>, vector<8x128xf32>
    %100 = arith.truncf %89 : vector<8x128xf32> to vector<8x128xbf16>
    %cst_46 = arith.constant dense<0.000000e+00> : vector<8x128xf32>
    %101 = tpu.matmul %100, %8, %cst_46 {dimension_numbers = #tpu.dot_dimension_numbers<[1], [0], [0], [1], [0, 0, 1, 1], [], []>} : vector<8x128xbf16>, vector<128x128xbf16>, vector<8x128xf32> -> vector<8x128xf32>
    %102 = arith.addf %99, %101 : vector<8x128xf32>
    %103 = math.tanh %102 : vector<8x128xf32>
    %104 = arith.truncf %103 : vector<8x128xf32> to vector<8x128xbf16>
    %cst_47 = arith.constant dense<0.000000e+00> : vector<8x128xf32>
    %105 = tpu.matmul %104, %9, %cst_47 {dimension_numbers = #tpu.dot_dimension_numbers<[1], [0], [0], [1], [0, 0, 1, 1], [], []>} : vector<8x128xbf16>, vector<128x128xbf16>, vector<8x128xf32> -> vector<8x128xf32>
    %106 = vector.broadcast %10 : vector<1x128xf32> to vector<8x128xf32>
    %107 = arith.addf %105, %106 : vector<8x128xf32>
    %108 = arith.index_cast %97 : i32 to index
    %c0_48 = arith.constant 0 : index
    %109 = vector.load %arg12[%108, %c0_48] : memref<64x128xf32, #tpu.memory_space<vmem>>, vector<8x128xf32>
    tpu.vector_store %arg12[%108, %c0_48], %107 {strides = array<i32>} : memref<64x128xf32, #tpu.memory_space<vmem>>, vector<8x128xf32>,
    %c7_i32 = arith.constant 7 : i32
    %c8_i32_49 = arith.constant 8 : i32
    %110 = arith.muli %c7_i32, %c8_i32_49 : i32
    %111 = tpu.assume_multiple %110, 8 : i32
    %112 = arith.index_cast %111 : i32 to index
    %c0_50 = arith.constant 0 : index
    %113 = vector.load %arg11[%112, %c0_50] : memref<64x128xf32, #tpu.memory_space<vmem>>, vector<8x128xf32>
    %114 = arith.truncf %103 : vector<8x128xf32> to vector<8x128xbf16>
    %cst_51 = arith.constant dense<0.000000e+00> : vector<8x128xf32>
    %115 = tpu.matmul %114, %8, %cst_51 {dimension_numbers = #tpu.dot_dimension_numbers<[1], [0], [0], [1], [0, 0, 1, 1], [], []>} : vector<8x128xbf16>, vector<128x128xbf16>, vector<8x128xf32> -> vector<8x128xf32>
    %116 = arith.addf %113, %115 : vector<8x128xf32>
    %117 = math.tanh %116 : vector<8x128xf32>
    %118 = arith.truncf %117 : vector<8x128xf32> to vector<8x128xbf16>
    %cst_52 = arith.constant dense<0.000000e+00> : vector<8x128xf32>
    %119 = tpu.matmul %118, %9, %cst_52 {dimension_numbers = #tpu.dot_dimension_numbers<[1], [0], [0], [1], [0, 0, 1, 1], [], []>} : vector<8x128xbf16>, vector<128x128xbf16>, vector<8x128xf32> -> vector<8x128xf32>
    %120 = vector.broadcast %10 : vector<1x128xf32> to vector<8x128xf32>
    %121 = arith.addf %119, %120 : vector<8x128xf32>
    %122 = arith.index_cast %111 : i32 to index
    %c0_53 = arith.constant 0 : index
    %123 = vector.load %arg12[%122, %c0_53] : memref<64x128xf32, #tpu.memory_space<vmem>>, vector<8x128xf32>
    tpu.vector_store %arg12[%122, %c0_53], %121 {strides = array<i32>} : memref<64x128xf32, #tpu.memory_space<vmem>>, vector<8x128xf32>,
    %c8_i32_54 = arith.constant 8 : i32
    %c0_55 = arith.constant 0 : index
    %c0_56 = arith.constant 0 : index
    %124 = vector.load %arg6[%c0_55, %c0_56] : memref<128x128xbf16, #tpu.memory_space<vmem>>, vector<128x128xbf16>
    %cst_57 = arith.constant 0.000000e+00 : f32
    %125 = vector.broadcast %cst_57 : f32 to vector<8x128xf32>
    %c0_i32_58 = arith.constant 0 : i32
    %c8_i32_59 = arith.constant 8 : i32
    %126 = arith.muli %c0_i32_58, %c8_i32_59 : i32
    %127 = tpu.assume_multiple %126, 8 : i32
    %128 = arith.index_cast %127 : i32 to index
    %c0_60 = arith.constant 0 : index
    %129 = vector.load %arg12[%128, %c0_60] : memref<64x128xf32, #tpu.memory_space<vmem>>, vector<8x128xf32>
    %130 = arith.truncf %125 : vector<8x128xf32> to vector<8x128xbf16>
    %cst_61 = arith.constant dense<0.000000e+00> : vector<8x128xf32>
    %131 = tpu.matmul %130, %124, %cst_61 {dimension_numbers = #tpu.dot_dimension_numbers<[1], [0], [0], [1], [0, 0, 1, 1], [], []>} : vector<8x128xbf16>, vector<128x128xbf16>, vector<8x128xf32> -> vector<8x128xf32>
    %132 = arith.addf %129, %131 : vector<8x128xf32>
    %133 = math.tanh %132 : vector<8x128xf32>
    %c1_i32_62 = arith.constant 1 : i32
    %c8_i32_63 = arith.constant 8 : i32
    %134 = arith.muli %c1_i32_62, %c8_i32_63 : i32
    %135 = tpu.assume_multiple %134, 8 : i32
    %136 = arith.index_cast %135 : i32 to index
    %c0_64 = arith.constant 0 : index
    %137 = vector.load %arg12[%136, %c0_64] : memref<64x128xf32, #tpu.memory_space<vmem>>, vector<8x128xf32>
    %138 = arith.truncf %133 : vector<8x128xf32> to vector<8x128xbf16>
    %cst_65 = arith.constant dense<0.000000e+00> : vector<8x128xf32>
    %139 = tpu.matmul %138, %124, %cst_65 {dimension_numbers = #tpu.dot_dimension_numbers<[1], [0], [0], [1], [0, 0, 1, 1], [], []>} : vector<8x128xbf16>, vector<128x128xbf16>, vector<8x128xf32> -> vector<8x128xf32>
    %140 = arith.addf %137, %139 : vector<8x128xf32>
    %141 = math.tanh %140 : vector<8x128xf32>
    %c2_i32_66 = arith.constant 2 : i32
    %c8_i32_67 = arith.constant 8 : i32
    %142 = arith.muli %c2_i32_66, %c8_i32_67 : i32
    %143 = tpu.assume_multiple %142, 8 : i32
    %144 = arith.index_cast %143 : i32 to index
    %c0_68 = arith.constant 0 : index
    %145 = vector.load %arg12[%144, %c0_68] : memref<64x128xf32, #tpu.memory_space<vmem>>, vector<8x128xf32>
    %146 = arith.truncf %141 : vector<8x128xf32> to vector<8x128xbf16>
    %cst_69 = arith.constant dense<0.000000e+00> : vector<8x128xf32>
    %147 = tpu.matmul %146, %124, %cst_69 {dimension_numbers = #tpu.dot_dimension_numbers<[1], [0], [0], [1], [0, 0, 1, 1], [], []>} : vector<8x128xbf16>, vector<128x128xbf16>, vector<8x128xf32> -> vector<8x128xf32>
    %148 = arith.addf %145, %147 : vector<8x128xf32>
    %149 = math.tanh %148 : vector<8x128xf32>
    %c3_i32_70 = arith.constant 3 : i32
    %c8_i32_71 = arith.constant 8 : i32
    %150 = arith.muli %c3_i32_70, %c8_i32_71 : i32
    %151 = tpu.assume_multiple %150, 8 : i32
    %152 = arith.index_cast %151 : i32 to index
    %c0_72 = arith.constant 0 : index
    %153 = vector.load %arg12[%152, %c0_72] : memref<64x128xf32, #tpu.memory_space<vmem>>, vector<8x128xf32>
    %154 = arith.truncf %149 : vector<8x128xf32> to vector<8x128xbf16>
    %cst_73 = arith.constant dense<0.000000e+00> : vector<8x128xf32>
    %155 = tpu.matmul %154, %124, %cst_73 {dimension_numbers = #tpu.dot_dimension_numbers<[1], [0], [0], [1], [0, 0, 1, 1], [], []>} : vector<8x128xbf16>, vector<128x128xbf16>, vector<8x128xf32> -> vector<8x128xf32>
    %156 = arith.addf %153, %155 : vector<8x128xf32>
    %157 = math.tanh %156 : vector<8x128xf32>
    %c4_i32_74 = arith.constant 4 : i32
    %c8_i32_75 = arith.constant 8 : i32
    %158 = arith.muli %c4_i32_74, %c8_i32_75 : i32
    %159 = tpu.assume_multiple %158, 8 : i32
    %160 = arith.index_cast %159 : i32 to index
    %c0_76 = arith.constant 0 : index
    %161 = vector.load %arg12[%160, %c0_76] : memref<64x128xf32, #tpu.memory_space<vmem>>, vector<8x128xf32>
    %162 = arith.truncf %157 : vector<8x128xf32> to vector<8x128xbf16>
    %cst_77 = arith.constant dense<0.000000e+00> : vector<8x128xf32>
    %163 = tpu.matmul %162, %124, %cst_77 {dimension_numbers = #tpu.dot_dimension_numbers<[1], [0], [0], [1], [0, 0, 1, 1], [], []>} : vector<8x128xbf16>, vector<128x128xbf16>, vector<8x128xf32> -> vector<8x128xf32>
    %164 = arith.addf %161, %163 : vector<8x128xf32>
    %165 = math.tanh %164 : vector<8x128xf32>
    %c5_i32_78 = arith.constant 5 : i32
    %c8_i32_79 = arith.constant 8 : i32
    %166 = arith.muli %c5_i32_78, %c8_i32_79 : i32
    %167 = tpu.assume_multiple %166, 8 : i32
    %168 = arith.index_cast %167 : i32 to index
    %c0_80 = arith.constant 0 : index
    %169 = vector.load %arg12[%168, %c0_80] : memref<64x128xf32, #tpu.memory_space<vmem>>, vector<8x128xf32>
    %170 = arith.truncf %165 : vector<8x128xf32> to vector<8x128xbf16>
    %cst_81 = arith.constant dense<0.000000e+00> : vector<8x128xf32>
    %171 = tpu.matmul %170, %124, %cst_81 {dimension_numbers = #tpu.dot_dimension_numbers<[1], [0], [0], [1], [0, 0, 1, 1], [], []>} : vector<8x128xbf16>, vector<128x128xbf16>, vector<8x128xf32> -> vector<8x128xf32>
    %172 = arith.addf %169, %171 : vector<8x128xf32>
    %173 = math.tanh %172 : vector<8x128xf32>
    %c6_i32_82 = arith.constant 6 : i32
    %c8_i32_83 = arith.constant 8 : i32
    %174 = arith.muli %c6_i32_82, %c8_i32_83 : i32
    %175 = tpu.assume_multiple %174, 8 : i32
    %176 = arith.index_cast %175 : i32 to index
    %c0_84 = arith.constant 0 : index
    %177 = vector.load %arg12[%176, %c0_84] : memref<64x128xf32, #tpu.memory_space<vmem>>, vector<8x128xf32>
    %178 = arith.truncf %173 : vector<8x128xf32> to vector<8x128xbf16>
    %cst_85 = arith.constant dense<0.000000e+00> : vector<8x128xf32>
    %179 = tpu.matmul %178, %124, %cst_85 {dimension_numbers = #tpu.dot_dimension_numbers<[1], [0], [0], [1], [0, 0, 1, 1], [], []>} : vector<8x128xbf16>, vector<128x128xbf16>, vector<8x128xf32> -> vector<8x128xf32>
    %180 = arith.addf %177, %179 : vector<8x128xf32>
    %181 = math.tanh %180 : vector<8x128xf32>
    %c7_i32_86 = arith.constant 7 : i32
    %c8_i32_87 = arith.constant 8 : i32
    %182 = arith.muli %c7_i32_86, %c8_i32_87 : i32
    %183 = tpu.assume_multiple %182, 8 : i32
    %184 = arith.index_cast %183 : i32 to index
    %c0_88 = arith.constant 0 : index
    %185 = vector.load %arg12[%184, %c0_88] : memref<64x128xf32, #tpu.memory_space<vmem>>, vector<8x128xf32>
    %186 = arith.truncf %181 : vector<8x128xf32> to vector<8x128xbf16>
    %cst_89 = arith.constant dense<0.000000e+00> : vector<8x128xf32>
    %187 = tpu.matmul %186, %124, %cst_89 {dimension_numbers = #tpu.dot_dimension_numbers<[1], [0], [0], [1], [0, 0, 1, 1], [], []>} : vector<8x128xbf16>, vector<128x128xbf16>, vector<8x128xf32> -> vector<8x128xf32>
    %188 = arith.addf %185, %187 : vector<8x128xf32>
    %189 = math.tanh %188 : vector<8x128xf32>
    %c8_i32_90 = arith.constant 8 : i32
    %190 = arith.truncf %189 : vector<8x128xf32> to vector<8x128xbf16>
    %c0_91 = arith.constant 0 : index
    %c0_92 = arith.constant 0 : index
    %191 = vector.load %arg8[%c0_91, %c0_92] : memref<128x128xbf16, #tpu.memory_space<vmem>>, vector<128x128xbf16>
    %cst_93 = arith.constant dense<0.000000e+00> : vector<8x128xf32>
    %192 = tpu.matmul %190, %191, %cst_93 {dimension_numbers = #tpu.dot_dimension_numbers<[1], [0], [0], [1], [0, 0, 1, 1], [], []>} : vector<8x128xbf16>, vector<128x128xbf16>, vector<8x128xf32> -> vector<8x128xf32>
    %c0_94 = arith.constant 0 : index
    %c0_95 = arith.constant 0 : index
    %193 = vector.load %arg9[%c0_94, %c0_95] : memref<1x128xf32, #tpu.memory_space<vmem>>, vector<1x128xf32>
    %194 = vector.broadcast %193 : vector<1x128xf32> to vector<8x128xf32>
    %195 = arith.addf %192, %194 : vector<8x128xf32>
    %c0_96 = arith.constant 0 : index
    %c0_97 = arith.constant 0 : index
    %c0_98 = arith.constant 0 : index
    %196 = vector.load %arg10[%c0_96, %c0_97, %c0_98] : memref<1x8x128xf32, #tpu.memory_space<vmem>>, vector<1x8x128xf32>
    %197 = vector.shape_cast %196 : vector<1x8x128xf32> to vector<8x128xf32>
    %198 = vector.shape_cast %195 : vector<8x128xf32> to vector<1x8x128xf32>
    tpu.vector_store %arg10[%c0_96, %c0_97, %c0_98], %198 {strides = array<i32>} : memref<1x8x128xf32, #tpu.memory_space<vmem>>, vector<1x8x128xf32>,
    return
  }
  func.func @transform_0(%arg0: i32) -> (i32, i32, i32) {
    %c0_i32 = arith.constant 0 : i32
    %c0_i32_0 = arith.constant 0 : i32
    %c0_i32_1 = arith.constant 0 : i32
    return %arg0, %c0_i32, %c0_i32_0 : i32, i32, i32
  }
  func.func @transform_1(%arg0: i32) -> (i32, i32) {
    %c0_i32 = arith.constant 0 : i32
    %c0_i32_0 = arith.constant 0 : i32
    %c0_i32_1 = arith.constant 0 : i32
    return %c0_i32, %c0_i32_0 : i32, i32
  }
  func.func @transform_2(%arg0: i32) -> (i32, i32) {
    %c0_i32 = arith.constant 0 : i32
    %c0_i32_0 = arith.constant 0 : i32
    %c0_i32_1 = arith.constant 0 : i32
    return %c0_i32, %c0_i32_0 : i32, i32
  }
  func.func @transform_3(%arg0: i32) -> (i32, i32) {
    %c0_i32 = arith.constant 0 : i32
    %c0_i32_0 = arith.constant 0 : i32
    %c0_i32_1 = arith.constant 0 : i32
    return %c0_i32, %c0_i32_0 : i32, i32
  }
  func.func @transform_4(%arg0: i32) -> (i32, i32) {
    %c0_i32 = arith.constant 0 : i32
    %c0_i32_0 = arith.constant 0 : i32
    %c0_i32_1 = arith.constant 0 : i32
    return %c0_i32, %c0_i32_0 : i32, i32
  }
  func.func @transform_5(%arg0: i32) -> (i32, i32) {
    %c0_i32 = arith.constant 0 : i32
    %c0_i32_0 = arith.constant 0 : i32
    %c0_i32_1 = arith.constant 0 : i32
    return %c0_i32, %c0_i32_0 : i32, i32
  }
  func.func @transform_6(%arg0: i32) -> (i32, i32) {
    %c0_i32 = arith.constant 0 : i32
    %c0_i32_0 = arith.constant 0 : i32
    %c0_i32_1 = arith.constant 0 : i32
    return %c0_i32, %c0_i32_0 : i32, i32
  }
  func.func @transform_7(%arg0: i32) -> (i32, i32) {
    %c0_i32 = arith.constant 0 : i32
    %c0_i32_0 = arith.constant 0 : i32
    %c0_i32_1 = arith.constant 0 : i32
    return %c0_i32, %c0_i32_0 : i32, i32
  }
  func.func @transform_8(%arg0: i32) -> (i32, i32) {
    %c0_i32 = arith.constant 0 : i32
    %c0_i32_0 = arith.constant 0 : i32
    %c0_i32_1 = arith.constant 0 : i32
    return %c0_i32, %c0_i32_0 : i32, i32
  }
  func.func @transform_9(%arg0: i32) -> (i32, i32, i32) {
    %c0_i32 = arith.constant 0 : i32
    %c0_i32_0 = arith.constant 0 : i32
    %c0_i32_1 = arith.constant 0 : i32
    return %arg0, %c0_i32, %c0_i32_0 : i32, i32, i32
  }
}

</mosaic_0001>

<bundles_post_ra>
// kernel: tpu_custom_call.1
= control target key start
LH: loop header
LB: loop body
LE: loop exit
PB: predicated region body
PF: predicated region fallthrough
CT: control target
= control target key end

     0   :  { %14 = vsyncpa [#allocation5], 0  ;;  %s3377_s0 = inlined_call_operand.hbm [shape: bf16[1,64,128], index: 0, kind: input, shape index: {}]   ;;  %s3378_s1 = inlined_call_operand.hbm [shape: bf16[128,128], index: 1, kind: input, shape index: {}]   ;;  %s3379_s2 = inlined_call_operand.hbm [shape: bf16[128,128], index: 2, kind: input, shape index: {}]   ;;  %s3380_s3 = inlined_call_operand.vmem [shape: f32[1,128], index: 3, kind: input, shape index: {}]   ;;  %s3381_s4 = inlined_call_operand.hbm [shape: bf16[128,128], index: 4, kind: input, shape index: {}]   ;;  %s3382_s5 = inlined_call_operand.hbm [shape: bf16[128,128], index: 5, kind: input, shape index: {}]   ;;  %s3383_s6 = inlined_call_operand.vmem [shape: f32[1,128], index: 6, kind: input, shape index: {}]   ;;  %s3384_s7 = inlined_call_operand.hbm [shape: bf16[128,128], index: 7, kind: input, shape index: {}]   ;;  %s3385_s8 = inlined_call_operand.vmem [shape: f32[1,128], index: 8, kind: input, shape index: {}]   ;;  %s3386_s9 = inlined_call_operand.hbm [shape: f32[1,8,128], index: 9, kind: output, shape index: {}]  }
   0x1   :  { %15 = vsyncpa [#allocation8], 0 }
   0x2   :  { %16 = vsyncpa [#allocation11], 0 }
   0x3   :  { %17 = vsyncpa [#allocation14], 0 }
   0x4   :  { %18 = vsyncpa [#allocation6], 0  ;;  %s2713_s30 = smov [#allocation7]   ;;  %s2714_s11 = smov [#allocation10]  }
   0x5   :  { %s36_s10 = sshll.u32 %s2713_s30, 4  ;;  %s62_s12 = sshll.u32 %s2714_s11, 4  ;;  %s37_s10 = int_to_ptr.vmem [resolvable:$true] %s36_s10  ;;  %s63_s12 = int_to_ptr.vmem [resolvable:$true] %s62_s12 }
   0x6   :  { %s2571_s13 = scalar_lea.vmem %s37_s10, 1024  ;;  %p2576_p1 = scmp.lt.s32.totalorder %s37_s10, %s37_s10 }
   0x7   :  { %p2572_p0 = scmp.ne.s32.totalorder %s37_s10, %s2571_s13  ;;  %p2577_p2 = scmp.lt.s32.totalorder %s2571_s13, %s2571_s13 }
   0x9   :  { %p2578_p3 = por %p2577_p2, %p2576_p1 }
   0xb   :  { %p2579_p4 = pnand %p2578_p3, %p2572_p0 }
   0xd   :  { %2582 = shalt.err (!%p2579_p4)
}
   0xe   :  { %s2715_s14 = smov 64   ;;  %s2716_s15 = smov 4  }
   0xf   :  { %42 = dma.hbm_to_vmem [thread:$0]  %s3378_s1, 1024, %s37_s10, [#allocation8], %s2715_s14, %s2715_s14, %s2716_s15  }
  0x10   :  { %s2591_s18 = scalar_lea.vmem %s63_s12, 1024  ;;  %p2596_p6 = scmp.lt.s32.totalorder %s63_s12, %s63_s12 }
  0x11   :  { %p2592_p5 = scmp.ne.s32.totalorder %s63_s12, %s2591_s18  ;;  %p2597_p7 = scmp.lt.s32.totalorder %s2591_s18, %s2591_s18 }
  0x13   :  { %p2598_p8 = por %p2597_p7, %p2596_p6 }
  0x15   :  { %p2599_p9 = pnand %p2598_p8, %p2592_p5 }
  0x17   :  { %2602 = shalt.err (!%p2599_p9)
}
  0x18   :  { %68 = dma.hbm_to_vmem [thread:$0]  %s3381_s4, 1024, %s63_s12, [#allocation11], %s2715_s14, %s2715_s14, %s2716_s15  }
  0x19   :  { %s2717_s21 = smov [#allocation4]   ;;  %s2718_s23 = smov [#allocation9]  }
  0x1a   :  { %s24_s22 = sshll.u32 %s2717_s21, 4  ;;  %s48_s24 = sshll.u32 %s2718_s23, 4  ;;  %s25_s22 = int_to_ptr.vmem [resolvable:$true] %s24_s22  ;;  %s49_s24 = int_to_ptr.vmem [resolvable:$true] %s48_s24 }
  0x1b   :  { %s2611_s1 = scalar_lea.vmem %s25_s22, 512  ;;  %p2616_p11 = scmp.lt.s32.totalorder %s25_s22, %s25_s22 }
  0x1c   :  { %p2612_p10 = scmp.ne.s32.totalorder %s25_s22, %s2611_s1  ;;  %p2617_p12 = scmp.lt.s32.totalorder %s2611_s1, %s2611_s1 }
  0x1e   :  { %p2618_p13 = por %p2617_p12, %p2616_p11 }
  0x20   :  { %p2619_p0 = pnand %p2618_p13, %p2612_p10 }
  0x22   :  { %2622 = shalt.err (!%p2619_p0)
}
  0x23   :  { %30 = dma.hbm_to_vmem [thread:$0]  %s3377_s0, 512, %s25_s22, [#allocation5], %s2715_s14, %s2715_s14, %s2716_s15  }
  0x24   :  { %s2631_s4 = scalar_lea.vmem %s49_s24, 1024  ;;  %p2636_p2 = scmp.lt.s32.totalorder %s49_s24, %s49_s24 }
  0x25   :  { %p2632_p1 = scmp.ne.s32.totalorder %s49_s24, %s2631_s4  ;;  %p2637_p3 = scmp.lt.s32.totalorder %s2631_s4, %s2631_s4 }
  0x27   :  { %p2638_p4 = por %p2637_p3, %p2636_p2 }
  0x29   :  { %p2639_p5 = pnand %p2638_p4, %p2632_p1 }
  0x2b   :  { %2642 = shalt.err (!%p2639_p5)
}
  0x2c   :  { %54 = dma.hbm_to_vmem [thread:$0]  %s3379_s2, 1024, %s49_s24, [#allocation8], %s2715_s14, %s2715_s14, %s2716_s15  }
  0x2d   :  { %s2719_s29 = smov [#allocation12]   ;;  %s2720_s10 = smov [#allocation13]  }
  0x2e   :  { %s74_s30 = sshll.u32 %s2719_s29, 4  ;;  %s88_s11 = sshll.u32 %s2720_s10, 4  ;;  %s75_s30 = int_to_ptr.vmem [resolvable:$true] %s74_s30  ;;  %s89_s11 = int_to_ptr.vmem [resolvable:$true] %s88_s11 }
  0x2f   :  { %s2651_s0 = scalar_lea.vmem %s75_s30, 1024  ;;  %p2656_p7 = scmp.lt.s32.totalorder %s75_s30, %s75_s30 }
  0x30   :  { %p2652_p6 = scmp.ne.s32.totalorder %s75_s30, %s2651_s0  ;;  %p2657_p8 = scmp.lt.s32.totalorder %s2651_s0, %s2651_s0 }
  0x32   :  { %p2658_p9 = por %p2657_p8, %p2656_p7 }
  0x34   :  { %p2659_p10 = pnand %p2658_p9, %p2652_p6 }
  0x36   :  { %2662 = shalt.err (!%p2659_p10)
}
  0x37   :  { %80 = dma.hbm_to_vmem [thread:$0]  %s3382_s5, 1024, %s75_s30, [#allocation11], %s2715_s14, %s2715_s14, %s2716_s15  }
  0x38   :  { %s2671_s2 = scalar_lea.vmem %s89_s11, 1024  ;;  %p2676_p12 = scmp.lt.s32.totalorder %s89_s11, %s89_s11 }
  0x39   :  { %p2672_p11 = scmp.ne.s32.totalorder %s89_s11, %s2671_s2  ;;  %p2677_p13 = scmp.lt.s32.totalorder %s2671_s2, %s2671_s2 }
  0x3b   :  { %p2678_p0 = por %p2677_p13, %p2676_p12 }
  0x3d   :  { %p2679_p1 = pnand %p2678_p0, %p2672_p11 }
  0x3f   :  { %2682 = shalt.err (!%p2679_p1)
}
  0x40   :  { %94 = dma.hbm_to_vmem [thread:$0]  %s3384_s7, 1024, %s89_s11, [#allocation14], %s2715_s14, %s2715_s14, %s2716_s15  }
  0x41   :  { %2703 = dma.done.wait [#allocation5], 512  }
  0x42   :  { %2704 = vsyncadd [#allocation5], 4294966784 }
  0x43   :  { %2705 = dma.done.wait [#allocation8], 2048  }
  0x44   :  { %2706 = vsyncadd [#allocation8], 4294965248 }
  0x45   :  { %2707 = dma.done.wait [#allocation11], 2048  }
  0x46   :  { %2708 = vsyncadd [#allocation11], 4294965248 }
  0x47   :  { %2709 = dma.done.wait [#allocation14], 1024  }
  0x48   :  { %2710 = vsyncadd [#allocation14], 4294966272  ;;  %v2721_v0 = vmov 0.0   ;;  %vm2722_vm0 = vmmov 0   ;;  %v2487_v1 = vld [vmem:[#allocation7 + $0x38] sm:$0xff]   ;;  %v2489_v3 = vld [vmem:[#allocation7 + $0x30] sm:$0xff]  }
  0x49   :  { %1975 = vmatprep.subr.bf16.mxu1 %v2721_v0  ;;  %1991 = vmatprep.mubr.msk.bf16.mxu1 %vm2722_vm0, %v2721_v0  ;;  %v2814_v2 = vld [vmem:[#allocation9 + $0x38] sm:$0xff]   ;;  %v2817_v4 = vld [vmem:[#allocation9 + $0x30] sm:$0xff]   ;;  %v2491_v5 = vld [vmem:[#allocation7 + $0x28] sm:$0xff]   ;;  %v2723_v21 = vmov 0   ;;  %s2724_s18 = smov [#allocation15]  }
  0x4a   :  { %1951 = vmatprep.subr.bf16.mxu0 %v2487_v1  ;;  %1976 = vmatpush3.bf16.msra.mxu1 %v2814_v2  ;;  %v2821_v6 = vld [vmem:[#allocation9 + $0x28] sm:$0xff]   ;;  %v2493_v7 = vld [vmem:[#allocation7 + $0x20] sm:$0xff]   ;;  %v2495_v9 = vld [vmem:[#allocation7 + $0x18] sm:$0xff]   ;;  %s1655_s19 = sshll.u32 %s2724_s18, 4  ;;  %s1656_s19 = int_to_ptr.vmem [resolvable:$true] %s1655_s19 }
  0x4b   :  { %1952 = vmatpush3.bf16.msra.mxu0 %v2487_v1  ;;  %1977 = vmatprep.subr.bf16.mxu1 %v2721_v0  ;;  %v2825_v8 = vld [vmem:[#allocation9 + $0x20] sm:$0xff]   ;;  %v2828_v10 = vld [vmem:[#allocation9 + $0x18] sm:$0xff]   ;;  %v2497_v11 = vld [vmem:[#allocation7 + $0x10] sm:$0xff]   ;;  %s2683_s20 = scalar_lea.vmem %s1656_s19, 128  ;;  %p2688_p3 = scmp.lt.s32.totalorder %s1656_s19, %s1656_s19 }
  0x4c   :  { %1953 = vmatprep.subr.bf16.mxu0 %v2489_v3  ;;  %v2503_v12 = vld [vmem:[#allocation4] sm:$0xff]   ;;  %v2832_v13 = vld [vmem:[#allocation9 + $0x10] sm:$0xff]   ;;  %v2499_v14 = vld [vmem:[#allocation7 + $0x8] sm:$0xff]   ;;  %p2684_p2 = scmp.ne.s32.totalorder %s1656_s19, %s2683_s20  ;;  %p2689_p4 = scmp.lt.s32.totalorder %s2683_s20, %s2683_s20 }
  0x4d   :  { %1967 = vmatprep.mubr.bf16.mxu0 %v2503_v12  ;;  %v2836_v15 = vld [vmem:[#allocation9 + $0x8] sm:$0xff]   ;;  %v2501_v16 = vld [vmem:[#allocation7] sm:$0xff]   ;;  %v2844_v19 = vld [vmem:[#allocation10 + $0x38] sm:$0xff]  }
  0x4e   :  { %1978 = vmatpush3.bf16.msra.mxu1 %v2817_v4  ;;  %v2840_v17 = vld [vmem:[#allocation9] sm:$0xff]   ;;  %v2504_v18 = vld [vmem:[#allocation4 + $0x8] sm:$0xff]   ;;  %v2849_v20 = vld [vmem:[#allocation10 + $0x30] sm:$0xff]   ;;  %p2690_p5 = por %p2689_p4, %p2688_p3 }
  0x4f   :  { %1954 = vmatpush3.bf16.msra.mxu0 %v2489_v3  ;;  %1979 = vmatprep.subr.bf16.mxu1 %v2721_v0  ;;  %v2874_v22 = vld [vmem:[#allocation10 + $0x28] sm:$0xff]   ;;  %v2878_v23 = vld [vmem:[#allocation10 + $0x20] sm:$0xff]   ;;  %v2882_v24 = vld [vmem:[#allocation10 + $0x18] sm:$0xff]  }
  0x50   :  { %1955 = vmatprep.subr.bf16.mxu0 %v2491_v5  ;;  %v2886_v25 = vld [vmem:[#allocation10 + $0x10] sm:$0xff]   ;;  %v2512_v27 = vld [vmem:[#allocation4 + $0x18] sm:$0xff]   ;;  %v2890_v28 = vld [vmem:[#allocation10 + $0x8] sm:$0xff]   ;;  %p2691_p6 = pnand %p2690_p5, %p2684_p2 }
  0x51   :  { %v2511_v26 = vld [vmem:[#allocation4 + $0x10] sm:$0xff]   ;;  %v2896_v29 = vld [vmem:[#allocation10] sm:$0xff]  }
  0x52   :  { %1980 = vmatpush3.bf16.msra.mxu1 %v2821_v6  ;;  %v2905_v32 = vld [vmem:[%s3380_s3] ss:$0 sm:$0xff] }
  0x53   :  { %1956 = vmatpush3.bf16.msra.mxu0 %v2491_v5  ;;  %1981 = vmatprep.subr.bf16.mxu1 %v2721_v0 }
  0x54   :  { %1957 = vmatprep.subr.bf16.mxu0 %v2493_v7 }
  0x56   :  { %1982 = vmatpush3.bf16.msra.mxu1 %v2825_v8 }
  0x57   :  { %1958 = vmatpush3.bf16.msra.mxu0 %v2493_v7  ;;  %1983 = vmatprep.subr.bf16.mxu1 %v2721_v0 }
  0x58   :  { %1959 = vmatprep.subr.bf16.mxu0 %v2495_v9 }
  0x5a   :  { %1984 = vmatpush3.bf16.msra.mxu1 %v2828_v10 }
  0x5b   :  { %1960 = vmatpush3.bf16.msra.mxu0 %v2495_v9  ;;  %1985 = vmatprep.subr.bf16.mxu1 %v2721_v0 }
  0x5c   :  { %1961 = vmatprep.subr.bf16.mxu0 %v2497_v11 }
  0x5e   :  { %1986 = vmatpush3.bf16.msra.mxu1 %v2832_v13 }
  0x5f   :  { %1962 = vmatpush3.bf16.msra.mxu0 %v2497_v11  ;;  %1987 = vmatprep.subr.bf16.mxu1 %v2721_v0 }
  0x60   :  { %1963 = vmatprep.subr.bf16.mxu0 %v2499_v14 }
  0x62   :  { %1988 = vmatpush3.bf16.msra.mxu1 %v2836_v15 }
  0x63   :  { %1964 = vmatpush3.bf16.msra.mxu0 %v2499_v14  ;;  %1989 = vmatprep.subr.bf16.mxu1 %v2721_v0 }
  0x64   :  { %1965 = vmatprep.subr.bf16.mxu0 %v2501_v16 }
  0x66   :  { %1990 = vmatpush3.bf16.msra.mxu1 %v2840_v17 }
  0x67   :  { %1966 = vmatpush3.bf16.msra.mxu0 %v2501_v16  ;;  %2015 = vmatprep.subr.bf16.mxu1 %v2721_v0 }
  0x68   :  { %1995 = vmatprep.subr.bf16.mxu0 %v2721_v0 }
  0x69   :  { %1992 = vmatmul.mubr.bf16.vlgmr.msra.gmra.mxu1 %v2723_v21 }
  0x6a   :  { %1968 = vmatmul.mubr.bf16.vlgmr.msra.gmra.mxu0 %v2504_v18  ;;  %2016 = vmatpush3.bf16.msra.mxu1 %v2814_v2 }
  0x6b   :  { %1996 = vmatpush3.bf16.msra.mxu0 %v2844_v19  ;;  %2017 = vmatprep.subr.bf16.mxu1 %v2721_v0 }
  0x6c   :  { %1997 = vmatprep.subr.bf16.mxu0 %v2721_v0  ;;  %2031 = vmatprep.mubr.msk.bf16.mxu1 %vm2722_vm0, %v2721_v0 }
  0x6d   :  { %1971 = vmatprep.mubr.bf16.mxu0 %v2511_v26 }
  0x6e   :  { %2018 = vmatpush3.bf16.msra.mxu1 %v2817_v4 }
  0x6f   :  { %1998 = vmatpush3.bf16.msra.mxu0 %v2849_v20  ;;  %2019 = vmatprep.subr.bf16.mxu1 %v2721_v0 }
  0x70   :  { %1999 = vmatprep.subr.bf16.mxu0 %v2721_v0 }
  0x72   :  { %2020 = vmatpush3.bf16.msra.mxu1 %v2821_v6  ;;  %1972 = vmatmul.mubr.bf16.gmra.mxu0 %v2512_v27 }
  0x73   :  { %2021 = vmatprep.subr.bf16.mxu1 %v2721_v0  ;;  %2000 = vmatpush3.bf16.msra.mxu0 %v2874_v22 }
  0x74   :  { %2001 = vmatprep.subr.bf16.mxu0 %v2721_v0  ;;  %2011 = vmatprep.mubr.msk.bf16.mxu0 %vm2722_vm0, %v2721_v0 }
  0x76   :  { %2022 = vmatpush3.bf16.msra.mxu1 %v2825_v8 }
  0x77   :  { %2023 = vmatprep.subr.bf16.mxu1 %v2721_v0  ;;  %2002 = vmatpush3.bf16.msra.mxu0 %v2878_v23 }
  0x78   :  { %2003 = vmatprep.subr.bf16.mxu0 %v2721_v0 }
  0x7a   :  { %2024 = vmatpush3.bf16.msra.mxu1 %v2828_v10 }
  0x7b   :  { %2025 = vmatprep.subr.bf16.mxu1 %v2721_v0  ;;  %2004 = vmatpush3.bf16.msra.mxu0 %v2882_v24 }
  0x7c   :  { %2005 = vmatprep.subr.bf16.mxu0 %v2721_v0 }
  0x7e   :  { %2026 = vmatpush3.bf16.msra.mxu1 %v2832_v13 }
  0x7f   :  { %2027 = vmatprep.subr.bf16.mxu1 %v2721_v0  ;;  %2006 = vmatpush3.bf16.msra.mxu0 %v2886_v25 }
  0x80   :  { %2007 = vmatprep.subr.bf16.mxu0 %v2721_v0 }
  0x82   :  { %2028 = vmatpush3.bf16.msra.mxu1 %v2836_v15 }
  0x83   :  { %2029 = vmatprep.subr.bf16.mxu1 %v2721_v0  ;;  %2008 = vmatpush3.bf16.msra.mxu0 %v2890_v28 }
  0x84   :  { %2009 = vmatprep.subr.bf16.mxu0 %v2721_v0 }
  0x86   :  { %2030 = vmatpush3.bf16.msra.mxu1 %v2840_v17 }
  0x87   :  { %2055 = vmatprep.subr.bf16.mxu1 %v2721_v0  ;;  %2010 = vmatpush3.bf16.msra.mxu0 %v2896_v29 }
  0x88   :  { %2035 = vmatprep.subr.bf16.mxu0 %v2721_v0 }
 0x129   :  { %v408_v30 = vpop.f32.mrf.mxu1 }
 0x12a   :  { %v2900_v31 = vpop.f32.mrf.mxu0 }
 0x12b   :  { %v1993_v33 = vpop.f32.mrf.mxu1  ;;  %v262_v59 = vadd.f32 %v2900_v31, %v2905_v32 }
 0x12c   :  { %v253_v34 = vpop.f32.mrf.mxu0 }
 0x12d   :  { %v254_v35 = vadd.f32 %v2905_v32, %v253_v34  ;;  %v411_v36 = vpop.f32.mrf.mxu1 }
 0x12e   :  { %v2944_v41 = vpop.f32.mrf.mxu0 }
 0x12f   :  { %v414_v37 = vadd.f32 %v408_v30, %v254_v35  ;;  %v1994_v38 = vpop.f32.mrf.mxu1  ;;  %v265_v14 = vadd.f32 %v2944_v41, %v2905_v32 }
 0x130   :  { %v256_v42 = vpop.f32.mrf.mxu0 }
 0x131   :  { %2531 = vtanh.f32 %v414_v37  ;;  %v257_v47 = vadd.f32 %v2905_v32, %v256_v42 }
 0x132   :  { %v2946_v43 = vpop.f32.mrf.mxu0 }
 0x134   :  { %v2948_v44 = vpop.f32.mrf.mxu0 }
 0x135   :  { %v270_v38 = vadd.f32 %v2905_v32, %v2948_v44 }
 0x136   :  { %v2950_v45 = vpop.f32.mrf.mxu0 }
 0x138   :  { %v2952_v46 = vpop.f32.mrf.mxu0 }
 0x139   :  { %v273_v44 = vadd.f32 %v2905_v32, %v2952_v46 }
 0x13e   :  { %v2532_v39 = vpop.eup %2531 }
 0x13f   :  { %v416_v40 = vpack.c.bf16 %v2532_v39, %v2532_v39 }
 0x141   :  { %2012 = vmatmul.mubr.bf16.vlgmr.msra.gmra.mxu0 %v416_v40  ;;  %2032 = vmatmul.mubr.bf16.vlgmr.msra.gmra.mxu1 %v416_v40 }
 0x142   :  { %2036 = vmatpush3.bf16.msra.mxu0 %v2844_v19  ;;  %2056 = vmatpush3.bf16.msra.mxu1 %v2814_v2 }
 0x143   :  { %2037 = vmatprep.subr.bf16.mxu0 %v2721_v0  ;;  %2057 = vmatprep.subr.bf16.mxu1 %v2721_v0 }
 0x144   :  { %2051 = vmatprep.mubr.msk.bf16.mxu0 %vm2722_vm0, %v2721_v0  ;;  %2071 = vmatprep.mubr.msk.bf16.mxu1 %vm2722_vm0, %v2721_v0 }
 0x146   :  { %2038 = vmatpush3.bf16.msra.mxu0 %v2849_v20  ;;  %2058 = vmatpush3.bf16.msra.mxu1 %v2817_v4 }
 0x147   :  { %2039 = vmatprep.subr.bf16.mxu0 %v2721_v0  ;;  %2059 = vmatprep.subr.bf16.mxu1 %v2721_v0 }
 0x14a   :  { %2040 = vmatpush3.bf16.msra.mxu0 %v2874_v22  ;;  %2060 = vmatpush3.bf16.msra.mxu1 %v2821_v6 }
 0x14b   :  { %2041 = vmatprep.subr.bf16.mxu0 %v2721_v0  ;;  %2061 = vmatprep.subr.bf16.mxu1 %v2721_v0 }
 0x14e   :  { %2042 = vmatpush3.bf16.msra.mxu0 %v2878_v23  ;;  %2062 = vmatpush3.bf16.msra.mxu1 %v2825_v8 }
 0x14f   :  { %2043 = vmatprep.subr.bf16.mxu0 %v2721_v0  ;;  %2063 = vmatprep.subr.bf16.mxu1 %v2721_v0 }
 0x152   :  { %2044 = vmatpush3.bf16.msra.mxu0 %v2882_v24  ;;  %2064 = vmatpush3.bf16.msra.mxu1 %v2828_v10 }
 0x153   :  { %2045 = vmatprep.subr.bf16.mxu0 %v2721_v0  ;;  %2065 = vmatprep.subr.bf16.mxu1 %v2721_v0 }
 0x156   :  { %2046 = vmatpush3.bf16.msra.mxu0 %v2886_v25  ;;  %2066 = vmatpush3.bf16.msra.mxu1 %v2832_v13 }
 0x157   :  { %2047 = vmatprep.subr.bf16.mxu0 %v2721_v0  ;;  %2067 = vmatprep.subr.bf16.mxu1 %v2721_v0 }
 0x15a   :  { %2048 = vmatpush3.bf16.msra.mxu0 %v2890_v28  ;;  %2068 = vmatpush3.bf16.msra.mxu1 %v2836_v15 }
 0x15b   :  { %2049 = vmatprep.subr.bf16.mxu0 %v2721_v0  ;;  %2069 = vmatprep.subr.bf16.mxu1 %v2721_v0 }
 0x15e   :  { %2050 = vmatpush3.bf16.msra.mxu0 %v2896_v29  ;;  %2070 = vmatpush3.bf16.msra.mxu1 %v2840_v17 }
 0x15f   :  { %2075 = vmatprep.subr.bf16.mxu0 %v2721_v0  ;;  %2095 = vmatprep.subr.bf16.mxu1 %v2721_v0 }
 0x201   :  { %v2955_v48 = vpop.f32.mrf.mxu0  ;;  %v548_v49 = vpop.f32.mrf.mxu1 }
 0x202   :  { %v554_v50 = vadd.f32 %v548_v49, %v257_v47 }
 0x203   :  { %v2013_v51 = vpop.f32.mrf.mxu0  ;;  %v2033_v52 = vpop.f32.mrf.mxu1 }
 0x204   :  { %2533 = vtanh.f32 %v554_v50 }
 0x205   :  { %v508_v53 = vpop.f32.mrf.mxu0  ;;  %v551_v54 = vpop.f32.mrf.mxu1 }
 0x207   :  { %v2014_v55 = vpop.f32.mrf.mxu0  ;;  %v2034_v56 = vpop.f32.mrf.mxu1 }
 0x211   :  { %v2534_v57 = vpop.eup %2533 }
 0x212   :  { %v556_v58 = vpack.c.bf16 %v2534_v57, %v2534_v57 }
 0x214   :  { %2052 = vmatmul.mubr.bf16.vlgmr.msra.gmra.mxu0 %v556_v58  ;;  %2072 = vmatmul.mubr.bf16.vlgmr.msra.gmra.mxu1 %v556_v58 }
 0x215   :  { %2076 = vmatpush3.bf16.msra.mxu0 %v2844_v19  ;;  %2096 = vmatpush3.bf16.msra.mxu1 %v2814_v2 }
 0x216   :  { %2077 = vmatprep.subr.bf16.mxu0 %v2721_v0  ;;  %2097 = vmatprep.subr.bf16.mxu1 %v2721_v0 }
 0x217   :  { %2091 = vmatprep.mubr.msk.bf16.mxu0 %vm2722_vm0, %v2721_v0  ;;  %2111 = vmatprep.mubr.msk.bf16.mxu1 %vm2722_vm0, %v2721_v0 }
 0x219   :  { %2078 = vmatpush3.bf16.msra.mxu0 %v2849_v20  ;;  %2098 = vmatpush3.bf16.msra.mxu1 %v2817_v4 }
 0x21a   :  { %2079 = vmatprep.subr.bf16.mxu0 %v2721_v0  ;;  %2099 = vmatprep.subr.bf16.mxu1 %v2721_v0 }
 0x21d   :  { %2080 = vmatpush3.bf16.msra.mxu0 %v2874_v22  ;;  %2100 = vmatpush3.bf16.msra.mxu1 %v2821_v6 }
 0x21e   :  { %2081 = vmatprep.subr.bf16.mxu0 %v2721_v0  ;;  %2101 = vmatprep.subr.bf16.mxu1 %v2721_v0 }
 0x221   :  { %2082 = vmatpush3.bf16.msra.mxu0 %v2878_v23  ;;  %2102 = vmatpush3.bf16.msra.mxu1 %v2825_v8 }
 0x222   :  { %2083 = vmatprep.subr.bf16.mxu0 %v2721_v0  ;;  %2103 = vmatprep.subr.bf16.mxu1 %v2721_v0 }
 0x225   :  { %2084 = vmatpush3.bf16.msra.mxu0 %v2882_v24  ;;  %2104 = vmatpush3.bf16.msra.mxu1 %v2828_v10 }
 0x226   :  { %2085 = vmatprep.subr.bf16.mxu0 %v2721_v0  ;;  %2105 = vmatprep.subr.bf16.mxu1 %v2721_v0 }
 0x229   :  { %2086 = vmatpush3.bf16.msra.mxu0 %v2886_v25  ;;  %2106 = vmatpush3.bf16.msra.mxu1 %v2832_v13 }
 0x22a   :  { %2087 = vmatprep.subr.bf16.mxu0 %v2721_v0  ;;  %2107 = vmatprep.subr.bf16.mxu1 %v2721_v0 }
 0x22d   :  { %2088 = vmatpush3.bf16.msra.mxu0 %v2890_v28  ;;  %2108 = vmatpush3.bf16.msra.mxu1 %v2836_v15 }
 0x22e   :  { %2089 = vmatprep.subr.bf16.mxu0 %v2721_v0  ;;  %2109 = vmatprep.subr.bf16.mxu1 %v2721_v0 }
 0x231   :  { %2090 = vmatpush3.bf16.msra.mxu0 %v2896_v29  ;;  %2110 = vmatpush3.bf16.msra.mxu1 %v2840_v17 }
 0x232   :  { %2115 = vmatprep.subr.bf16.mxu0 %v2721_v0  ;;  %2135 = vmatprep.subr.bf16.mxu1 %v2721_v0 }
 0x2d4   :  { %v2995_v60 = vpop.f32.mrf.mxu0  ;;  %v635_v61 = vpop.f32.mrf.mxu1 }
 0x2d5   :  { %v641_v62 = vadd.f32 %v635_v61, %v262_v59 }
 0x2d6   :  { %v2053_v63 = vpop.f32.mrf.mxu0  ;;  %v2073_v1 = vpop.f32.mrf.mxu1 }
 0x2d7   :  { %2535 = vtanh.f32 %v641_v62 }
 0x2d8   :  { %v594_v3 = vpop.f32.mrf.mxu0  ;;  %v638_v5 = vpop.f32.mrf.mxu1 }
 0x2da   :  { %v2054_v7 = vpop.f32.mrf.mxu0  ;;  %v2074_v9 = vpop.f32.mrf.mxu1 }
 0x2e4   :  { %v2536_v11 = vpop.eup %2535 }
 0x2e5   :  { %v643_v12 = vpack.c.bf16 %v2536_v11, %v2536_v11  ;;  %v3157_v11 = vld [vmem:[#allocation12 + $0x38] sm:$0xff]  }
 0x2e7   :  { %2092 = vmatmul.mubr.bf16.vlgmr.msra.gmra.mxu0 %v643_v12  ;;  %2112 = vmatmul.mubr.bf16.vlgmr.msra.gmra.mxu1 %v643_v12 }
 0x2e8   :  { %2116 = vmatpush3.bf16.msra.mxu0 %v2844_v19  ;;  %2136 = vmatpush3.bf16.msra.mxu1 %v2814_v2 }
 0x2e9   :  { %2117 = vmatprep.subr.bf16.mxu0 %v2721_v0  ;;  %2137 = vmatprep.subr.bf16.mxu1 %v2721_v0 }
 0x2ea   :  { %2131 = vmatprep.mubr.msk.bf16.mxu0 %vm2722_vm0, %v2721_v0  ;;  %2151 = vmatprep.mubr.msk.bf16.mxu1 %vm2722_vm0, %v2721_v0 }
 0x2ec   :  { %2118 = vmatpush3.bf16.msra.mxu0 %v2849_v20  ;;  %2138 = vmatpush3.bf16.msra.mxu1 %v2817_v4 }
 0x2ed   :  { %2119 = vmatprep.subr.bf16.mxu0 %v2721_v0  ;;  %2139 = vmatprep.subr.bf16.mxu1 %v2721_v0 }
 0x2f0   :  { %2120 = vmatpush3.bf16.msra.mxu0 %v2874_v22  ;;  %2140 = vmatpush3.bf16.msra.mxu1 %v2821_v6 }
 0x2f1   :  { %2121 = vmatprep.subr.bf16.mxu0 %v2721_v0  ;;  %2141 = vmatprep.subr.bf16.mxu1 %v2721_v0 }
 0x2f4   :  { %2122 = vmatpush3.bf16.msra.mxu0 %v2878_v23  ;;  %2142 = vmatpush3.bf16.msra.mxu1 %v2825_v8 }
 0x2f5   :  { %2123 = vmatprep.subr.bf16.mxu0 %v2721_v0  ;;  %2143 = vmatprep.subr.bf16.mxu1 %v2721_v0 }
 0x2f8   :  { %2124 = vmatpush3.bf16.msra.mxu0 %v2882_v24  ;;  %2144 = vmatpush3.bf16.msra.mxu1 %v2828_v10 }
 0x2f9   :  { %2125 = vmatprep.subr.bf16.mxu0 %v2721_v0  ;;  %2145 = vmatprep.subr.bf16.mxu1 %v2721_v0 }
 0x2fc   :  { %2126 = vmatpush3.bf16.msra.mxu0 %v2886_v25  ;;  %2146 = vmatpush3.bf16.msra.mxu1 %v2832_v13 }
 0x2fd   :  { %2127 = vmatprep.subr.bf16.mxu0 %v2721_v0  ;;  %2147 = vmatprep.subr.bf16.mxu1 %v2721_v0 }
 0x300   :  { %2128 = vmatpush3.bf16.msra.mxu0 %v2890_v28  ;;  %2148 = vmatpush3.bf16.msra.mxu1 %v2836_v15 }
 0x301   :  { %2129 = vmatprep.subr.bf16.mxu0 %v2721_v0  ;;  %2149 = vmatprep.subr.bf16.mxu1 %v2721_v0 }
 0x304   :  { %2130 = vmatpush3.bf16.msra.mxu0 %v2896_v29  ;;  %2150 = vmatpush3.bf16.msra.mxu1 %v2840_v17 }
 0x305   :  { %2155 = vmatprep.subr.bf16.mxu0 %v2721_v0  ;;  %2175 = vmatprep.subr.bf16.mxu1 %v2721_v0 }
 0x3a7   :  { %v3035_v16 = vpop.f32.mrf.mxu0  ;;  %v722_v18 = vpop.f32.mrf.mxu1 }
 0x3a8   :  { %v728_v26 = vadd.f32 %v722_v18, %v265_v14  ;;  %v3170_v14 = vld [vmem:[#allocation12 + $0x28] sm:$0xff]   ;;  %v3176_v18 = vld [vmem:[#allocation12 + $0x20] sm:$0xff]  }
 0x3a9   :  { %v2093_v27 = vpop.f32.mrf.mxu0  ;;  %v2113_v30 = vpop.f32.mrf.mxu1 }
 0x3aa   :  { %2537 = vtanh.f32 %v728_v26 }
 0x3ab   :  { %v681_v31 = vpop.f32.mrf.mxu0  ;;  %v725_v33 = vpop.f32.mrf.mxu1 }
 0x3ad   :  { %v2094_v34 = vpop.f32.mrf.mxu0  ;;  %v2114_v35 = vpop.f32.mrf.mxu1 }
 0x3b7   :  { %v2538_v36 = vpop.eup %2537 }
 0x3b8   :  { %v730_v37 = vpack.c.bf16 %v2538_v36, %v2538_v36 }
 0x3ba   :  { %2132 = vmatmul.mubr.bf16.vlgmr.msra.gmra.mxu0 %v730_v37  ;;  %2152 = vmatmul.mubr.bf16.vlgmr.msra.gmra.mxu1 %v730_v37 }
 0x3bb   :  { %2156 = vmatpush3.bf16.msra.mxu0 %v2844_v19  ;;  %2176 = vmatpush3.bf16.msra.mxu1 %v2814_v2 }
 0x3bc   :  { %2157 = vmatprep.subr.bf16.mxu0 %v2721_v0  ;;  %2177 = vmatprep.subr.bf16.mxu1 %v2721_v0 }
 0x3bd   :  { %2171 = vmatprep.mubr.msk.bf16.mxu0 %vm2722_vm0, %v2721_v0  ;;  %2191 = vmatprep.mubr.msk.bf16.mxu1 %vm2722_vm0, %v2721_v0 }
 0x3bf   :  { %2158 = vmatpush3.bf16.msra.mxu0 %v2849_v20  ;;  %2178 = vmatpush3.bf16.msra.mxu1 %v2817_v4 }
 0x3c0   :  { %2159 = vmatprep.subr.bf16.mxu0 %v2721_v0  ;;  %2179 = vmatprep.subr.bf16.mxu1 %v2721_v0 }
 0x3c3   :  { %2160 = vmatpush3.bf16.msra.mxu0 %v2874_v22  ;;  %2180 = vmatpush3.bf16.msra.mxu1 %v2821_v6 }
 0x3c4   :  { %2161 = vmatprep.subr.bf16.mxu0 %v2721_v0  ;;  %2181 = vmatprep.subr.bf16.mxu1 %v2721_v0 }
 0x3c7   :  { %2162 = vmatpush3.bf16.msra.mxu0 %v2878_v23  ;;  %2182 = vmatpush3.bf16.msra.mxu1 %v2825_v8 }
 0x3c8   :  { %2163 = vmatprep.subr.bf16.mxu0 %v2721_v0  ;;  %2183 = vmatprep.subr.bf16.mxu1 %v2721_v0 }
 0x3cb   :  { %2164 = vmatpush3.bf16.msra.mxu0 %v2882_v24  ;;  %2184 = vmatpush3.bf16.msra.mxu1 %v2828_v10 }
 0x3cc   :  { %2165 = vmatprep.subr.bf16.mxu0 %v2721_v0  ;;  %2185 = vmatprep.subr.bf16.mxu1 %v2721_v0 }
 0x3cf   :  { %2166 = vmatpush3.bf16.msra.mxu0 %v2886_v25  ;;  %2186 = vmatpush3.bf16.msra.mxu1 %v2832_v13 }
 0x3d0   :  { %2167 = vmatprep.subr.bf16.mxu0 %v2721_v0  ;;  %2187 = vmatprep.subr.bf16.mxu1 %v2721_v0 }
 0x3d3   :  { %2168 = vmatpush3.bf16.msra.mxu0 %v2890_v28  ;;  %2188 = vmatpush3.bf16.msra.mxu1 %v2836_v15 }
 0x3d4   :  { %2169 = vmatprep.subr.bf16.mxu0 %v2721_v0  ;;  %2189 = vmatprep.subr.bf16.mxu1 %v2721_v0 }
 0x3d7   :  { %2170 = vmatpush3.bf16.msra.mxu0 %v2896_v29  ;;  %2190 = vmatpush3.bf16.msra.mxu1 %v2840_v17 }
 0x3d8   :  { %2195 = vmatprep.subr.bf16.mxu0 %v2721_v0  ;;  %2215 = vmatprep.subr.bf16.mxu1 %v2721_v0 }
 0x47a   :  { %v3075_v39 = vpop.f32.mrf.mxu0  ;;  %v809_v40 = vpop.f32.mrf.mxu1 }
 0x47b   :  { %v815_v41 = vadd.f32 %v809_v40, %v270_v38 }
 0x47c   :  { %v2133_v42 = vpop.f32.mrf.mxu0  ;;  %v2153_v47 = vpop.f32.mrf.mxu1 }
 0x47d   :  { %2539 = vtanh.f32 %v815_v41 }
 0x47e   :  { %v768_v49 = vpop.f32.mrf.mxu0  ;;  %v812_v50 = vpop.f32.mrf.mxu1 }
 0x480   :  { %v2134_v51 = vpop.f32.mrf.mxu0  ;;  %v2154_v52 = vpop.f32.mrf.mxu1 }
 0x48a   :  { %v2540_v53 = vpop.eup %2539 }
 0x48b   :  { %v817_v54 = vpack.c.bf16 %v2540_v53, %v2540_v53 }
 0x48d   :  { %2172 = vmatmul.mubr.bf16.vlgmr.msra.gmra.mxu0 %v817_v54  ;;  %2192 = vmatmul.mubr.bf16.vlgmr.msra.gmra.mxu1 %v817_v54 }
 0x48e   :  { %2196 = vmatpush3.bf16.msra.mxu0 %v2844_v19  ;;  %2216 = vmatpush3.bf16.msra.mxu1 %v2814_v2 }
 0x48f   :  { %2197 = vmatprep.subr.bf16.mxu0 %v2721_v0  ;;  %2217 = vmatprep.subr.bf16.mxu1 %v2721_v0 }
 0x490   :  { %2211 = vmatprep.mubr.msk.bf16.mxu0 %vm2722_vm0, %v2721_v0  ;;  %2231 = vmatprep.mubr.msk.bf16.mxu1 %vm2722_vm0, %v2721_v0 }
 0x492   :  { %2198 = vmatpush3.bf16.msra.mxu0 %v2849_v20  ;;  %2218 = vmatpush3.bf16.msra.mxu1 %v2817_v4 }
 0x493   :  { %2199 = vmatprep.subr.bf16.mxu0 %v2721_v0  ;;  %2219 = vmatprep.subr.bf16.mxu1 %v2721_v0 }
 0x496   :  { %2200 = vmatpush3.bf16.msra.mxu0 %v2874_v22  ;;  %2220 = vmatpush3.bf16.msra.mxu1 %v2821_v6 }
 0x497   :  { %2201 = vmatprep.subr.bf16.mxu0 %v2721_v0  ;;  %2221 = vmatprep.subr.bf16.mxu1 %v2721_v0 }
 0x49a   :  { %2202 = vmatpush3.bf16.msra.mxu0 %v2878_v23  ;;  %2222 = vmatpush3.bf16.msra.mxu1 %v2825_v8 }
 0x49b   :  { %2203 = vmatprep.subr.bf16.mxu0 %v2721_v0  ;;  %2223 = vmatprep.subr.bf16.mxu1 %v2721_v0 }
 0x49e   :  { %2204 = vmatpush3.bf16.msra.mxu0 %v2882_v24  ;;  %2224 = vmatpush3.bf16.msra.mxu1 %v2828_v10 }
 0x49f   :  { %2205 = vmatprep.subr.bf16.mxu0 %v2721_v0  ;;  %2225 = vmatprep.subr.bf16.mxu1 %v2721_v0 }
 0x4a2   :  { %2206 = vmatpush3.bf16.msra.mxu0 %v2886_v25  ;;  %2226 = vmatpush3.bf16.msra.mxu1 %v2832_v13 }
 0x4a3   :  { %2207 = vmatprep.subr.bf16.mxu0 %v2721_v0  ;;  %2227 = vmatprep.subr.bf16.mxu1 %v2721_v0 }
 0x4a6   :  { %2208 = vmatpush3.bf16.msra.mxu0 %v2890_v28  ;;  %2228 = vmatpush3.bf16.msra.mxu1 %v2836_v15 }
 0x4a7   :  { %2209 = vmatprep.subr.bf16.mxu0 %v2721_v0  ;;  %2229 = vmatprep.subr.bf16.mxu1 %v2721_v0 }
 0x4aa   :  { %2210 = vmatpush3.bf16.msra.mxu0 %v2896_v29  ;;  %2230 = vmatpush3.bf16.msra.mxu1 %v2840_v17 }
 0x4ab   :  { %2255 = vmatprep.subr.bf16.mxu1 %v2721_v0  ;;  %2235 = vmatprep.subr.bf16.mxu0 %v2721_v0 }
 0x54d   :  { %v3115_v55 = vpop.f32.mrf.mxu0  ;;  %v896_v56 = vpop.f32.mrf.mxu1 }
 0x54e   :  { %v902_v57 = vadd.f32 %v896_v56, %v273_v44 }
 0x54f   :  { %v2173_v58 = vpop.f32.mrf.mxu0  ;;  %v2193_v59 = vpop.f32.mrf.mxu1 }
 0x550   :  { %2541 = vtanh.f32 %v902_v57 }
 0x551   :  { %v855_v61 = vpop.f32.mrf.mxu0  ;;  %v899_v62 = vpop.f32.mrf.mxu1 }
 0x553   :  { %v2174_v63 = vpop.f32.mrf.mxu0  ;;  %v2194_v1 = vpop.f32.mrf.mxu1 }
 0x55d   :  { %v2542_v3 = vpop.eup %2541 }
 0x55e   :  { %v904_v5 = vpack.c.bf16 %v2542_v3, %v2542_v3 }
 0x560   :  { %2212 = vmatmul.mubr.bf16.vlgmr.msra.gmra.mxu0 %v904_v5  ;;  %2232 = vmatmul.mubr.bf16.vlgmr.msra.gmra.mxu1 %v904_v5 }
 0x561   :  { %2256 = vmatpush3.bf16.msra.mxu1 %v2814_v2  ;;  %2236 = vmatpush3.bf16.msra.mxu0 %v2844_v19  ;;  %v278_v2 = vadd.f32 %v2946_v43, %v2905_v32  ;;  %v3160_v43 = vld [vmem:[#allocation12 + $0x30] sm:$0xff]  }
 0x562   :  { %2257 = vmatprep.subr.bf16.mxu1 %v2721_v0  ;;  %2237 = vmatprep.subr.bf16.mxu0 %v2721_v0 }
 0x563   :  { %2251 = vmatprep.mubr.msk.bf16.mxu0 %vm2722_vm0, %v2721_v0  ;;  %2271 = vmatprep.mubr.msk.bf16.mxu1 %vm2722_vm0, %v2721_v0 }
 0x565   :  { %2258 = vmatpush3.bf16.msra.mxu1 %v2817_v4  ;;  %2238 = vmatpush3.bf16.msra.mxu0 %v2849_v20 }
 0x566   :  { %2259 = vmatprep.subr.bf16.mxu1 %v2721_v0  ;;  %2239 = vmatprep.subr.bf16.mxu0 %v2721_v0 }
 0x569   :  { %2260 = vmatpush3.bf16.msra.mxu1 %v2821_v6  ;;  %2240 = vmatpush3.bf16.msra.mxu0 %v2874_v22 }
 0x56a   :  { %2261 = vmatprep.subr.bf16.mxu1 %v2721_v0  ;;  %2241 = vmatprep.subr.bf16.mxu0 %v2721_v0 }
 0x56d   :  { %2262 = vmatpush3.bf16.msra.mxu1 %v2825_v8  ;;  %2242 = vmatpush3.bf16.msra.mxu0 %v2878_v23 }
 0x56e   :  { %2263 = vmatprep.subr.bf16.mxu1 %v2721_v0  ;;  %2243 = vmatprep.subr.bf16.mxu0 %v2721_v0 }
 0x571   :  { %2264 = vmatpush3.bf16.msra.mxu1 %v2828_v10  ;;  %2244 = vmatpush3.bf16.msra.mxu0 %v2882_v24 }
 0x572   :  { %2265 = vmatprep.subr.bf16.mxu1 %v2721_v0  ;;  %2245 = vmatprep.subr.bf16.mxu0 %v2721_v0 }
 0x575   :  { %2266 = vmatpush3.bf16.msra.mxu1 %v2832_v13  ;;  %2246 = vmatpush3.bf16.msra.mxu0 %v2886_v25 }
 0x576   :  { %2267 = vmatprep.subr.bf16.mxu1 %v2721_v0  ;;  %2247 = vmatprep.subr.bf16.mxu0 %v2721_v0 }
 0x579   :  { %2268 = vmatpush3.bf16.msra.mxu1 %v2836_v15  ;;  %2248 = vmatpush3.bf16.msra.mxu0 %v2890_v28 }
 0x57a   :  { %2269 = vmatprep.subr.bf16.mxu1 %v2721_v0  ;;  %2249 = vmatprep.subr.bf16.mxu0 %v2721_v0 }
 0x57d   :  { %2270 = vmatpush3.bf16.msra.mxu1 %v2840_v17  ;;  %2250 = vmatpush3.bf16.msra.mxu0 %v2896_v29 }
 0x57e   :  { %2295 = vmatprep.subr.bf16.mxu1 %v2721_v0  ;;  %2275 = vmatprep.subr.bf16.mxu0 %v2721_v0 }
 0x620   :  { %v3155_v4 = vpop.f32.mrf.mxu0  ;;  %v983_v6 = vpop.f32.mrf.mxu1 }
 0x621   :  { %v989_v8 = vadd.f32 %v983_v6, %v278_v2 }
 0x622   :  { %v2213_v10 = vpop.f32.mrf.mxu0  ;;  %v2233_v13 = vpop.f32.mrf.mxu1 }
 0x623   :  { %2543 = vtanh.f32 %v989_v8 }
 0x624   :  { %v942_v15 = vpop.f32.mrf.mxu0  ;;  %v986_v46 = vpop.f32.mrf.mxu1 }
 0x626   :  { %v2214_v7 = vpop.f32.mrf.mxu0  ;;  %v2234_v17 = vpop.f32.mrf.mxu1 }
 0x630   :  { %v2544_v9 = vpop.eup %2543 }
 0x631   :  { %v991_v12 = vpack.c.bf16 %v2544_v9, %v2544_v9 }
 0x633   :  { %2252 = vmatmul.mubr.bf16.vlgmr.msra.gmra.mxu0 %v991_v12  ;;  %2272 = vmatmul.mubr.bf16.vlgmr.msra.gmra.mxu1 %v991_v12 }
 0x634   :  { %2296 = vmatpush3.bf16.msra.mxu1 %v3157_v11  ;;  %2311 = vmatprep.mubr.msk.bf16.mxu1 %vm2722_vm0, %v2721_v0 }
 0x635   :  { %2297 = vmatprep.subr.bf16.mxu1 %v2721_v0  ;;  %2276 = vmatpush3.bf16.msra.mxu0 %v2844_v19  ;;  %v3182_v19 = vld [vmem:[#allocation12 + $0x18] sm:$0xff]  }
 0x636   :  { %2277 = vmatprep.subr.bf16.mxu0 %v2721_v0  ;;  %2291 = vmatprep.mubr.msk.bf16.mxu0 %vm2722_vm0, %v2721_v0 }
 0x638   :  { %2298 = vmatpush3.bf16.msra.mxu1 %v3160_v43 }
 0x639   :  { %2299 = vmatprep.subr.bf16.mxu1 %v2721_v0  ;;  %2278 = vmatpush3.bf16.msra.mxu0 %v2849_v20  ;;  %v3188_v20 = vld [vmem:[#allocation12 + $0x10] sm:$0xff]  }
 0x63a   :  { %2279 = vmatprep.subr.bf16.mxu0 %v2721_v0 }
 0x63c   :  { %2300 = vmatpush3.bf16.msra.mxu1 %v3170_v14 }
 0x63d   :  { %2301 = vmatprep.subr.bf16.mxu1 %v2721_v0  ;;  %2280 = vmatpush3.bf16.msra.mxu0 %v2874_v22  ;;  %v3194_v22 = vld [vmem:[#allocation12 + $0x8] sm:$0xff]  }
 0x63e   :  { %2281 = vmatprep.subr.bf16.mxu0 %v2721_v0 }
 0x640   :  { %2302 = vmatpush3.bf16.msra.mxu1 %v3176_v18 }
 0x641   :  { %2303 = vmatprep.subr.bf16.mxu1 %v2721_v0  ;;  %2282 = vmatpush3.bf16.msra.mxu0 %v2878_v23  ;;  %v3200_v23 = vld [vmem:[#allocation12] sm:$0xff]  }
 0x642   :  { %2283 = vmatprep.subr.bf16.mxu0 %v2721_v0 }
 0x644   :  { %2304 = vmatpush3.bf16.msra.mxu1 %v3182_v19 }
 0x645   :  { %2305 = vmatprep.subr.bf16.mxu1 %v2721_v0  ;;  %2284 = vmatpush3.bf16.msra.mxu0 %v2882_v24 }
 0x646   :  { %2285 = vmatprep.subr.bf16.mxu0 %v2721_v0 }
 0x648   :  { %2306 = vmatpush3.bf16.msra.mxu1 %v3188_v20 }
 0x649   :  { %2307 = vmatprep.subr.bf16.mxu1 %v2721_v0  ;;  %2286 = vmatpush3.bf16.msra.mxu0 %v2886_v25 }
 0x64a   :  { %2287 = vmatprep.subr.bf16.mxu0 %v2721_v0 }
 0x64c   :  { %2308 = vmatpush3.bf16.msra.mxu1 %v3194_v22 }
 0x64d   :  { %2309 = vmatprep.subr.bf16.mxu1 %v2721_v0  ;;  %2288 = vmatpush3.bf16.msra.mxu0 %v2890_v28 }
 0x64e   :  { %2289 = vmatprep.subr.bf16.mxu0 %v2721_v0 }
 0x650   :  { %2310 = vmatpush3.bf16.msra.mxu1 %v3200_v23 }
 0x651   :  { %2290 = vmatpush3.bf16.msra.mxu0 %v2896_v29  ;;  %2335 = vmatprep.subr.bf16.mxu1 %v2721_v0 }
 0x652   :  { %2315 = vmatprep.subr.bf16.mxu0 %v2721_v0 }
 0x653   :  { %2312 = vmatmul.mubr.bf16.vlgmr.msra.gmra.mxu1 %v2723_v21  ;;  %v281_v21 = vadd.f32 %v2950_v45, %v2905_v32  ;;  %v3241_v32 = vld [vmem:[%s3383_s6] ss:$0 sm:$0xff] }
 0x654   :  { %2336 = vmatpush3.bf16.msra.mxu1 %v3157_v11  ;;  %2351 = vmatprep.mubr.msk.bf16.mxu1 %vm2722_vm0, %v2721_v0  ;;  %v506_v45 = vadd.f32 %v3241_v32, %v2955_v48  ;;  %v592_v52 = vadd.f32 %v3241_v32, %v2995_v60  ;;  %v679_v60 = vadd.f32 %v3241_v32, %v3035_v16 }
 0x655   :  { %2337 = vmatprep.subr.bf16.mxu1 %v2721_v0  ;;  %v766_v16 = vadd.f32 %v3241_v32, %v3075_v39  ;;  %v853_v39 = vadd.f32 %v3241_v32, %v3115_v55  ;;  %v940_v55 = vadd.f32 %v3241_v32, %v3155_v4 }
 0x658   :  { %2338 = vmatpush3.bf16.msra.mxu1 %v3160_v43 }
 0x659   :  { %2339 = vmatprep.subr.bf16.mxu1 %v2721_v0 }
 0x65c   :  { %2340 = vmatpush3.bf16.msra.mxu1 %v3170_v14 }
 0x65d   :  { %2341 = vmatprep.subr.bf16.mxu1 %v2721_v0 }
 0x660   :  { %2342 = vmatpush3.bf16.msra.mxu1 %v3176_v18 }
 0x661   :  { %2343 = vmatprep.subr.bf16.mxu1 %v2721_v0 }
 0x664   :  { %2344 = vmatpush3.bf16.msra.mxu1 %v3182_v19 }
 0x665   :  { %2345 = vmatprep.subr.bf16.mxu1 %v2721_v0 }
 0x668   :  { %2346 = vmatpush3.bf16.msra.mxu1 %v3188_v20 }
 0x669   :  { %2347 = vmatprep.subr.bf16.mxu1 %v2721_v0 }
 0x66c   :  { %2348 = vmatpush3.bf16.msra.mxu1 %v3194_v22 }
 0x66d   :  { %2349 = vmatprep.subr.bf16.mxu1 %v2721_v0 }
 0x670   :  { %2350 = vmatpush3.bf16.msra.mxu1 %v3200_v23 }
 0x671   :  { %2375 = vmatprep.subr.bf16.mxu1 %v2721_v0 }
 0x6f3   :  { %v3230_v24 = vpop.f32.mrf.mxu0  ;;  %v1070_v25 = vpop.f32.mrf.mxu1 }
 0x6f4   :  { %v1076_v28 = vadd.f32 %v1070_v25, %v281_v21  ;;  %v1027_v4 = vadd.f32 %v3241_v32, %v3230_v24  ;;  %v2529_v24 = vld [vmem:[#allocation13 + $0x8] sm:$0xff]  }
 0x6f5   :  { %v2253_v29 = vpop.f32.mrf.mxu0  ;;  %v2273_v26 = vpop.f32.mrf.mxu1 }
 0x6f6   :  { %2545 = vtanh.f32 %v1076_v28 }
 0x6f7   :  { %v1029_v27 = vpop.f32.mrf.mxu0  ;;  %v1073_v30 = vpop.f32.mrf.mxu1 }
 0x6f9   :  { %v2254_v31 = vpop.f32.mrf.mxu0  ;;  %v2274_v33 = vpop.f32.mrf.mxu1 }
 0x703   :  { %v2546_v34 = vpop.eup %2545 }
 0x704   :  { %v1078_v35 = vpack.c.bf16 %v2546_v34, %v2546_v34 }
 0x706   :  { %2292 = vmatmul.mubr.bf16.vlgmr.msra.gmra.mxu0 %v1078_v35 }
 0x707   :  { %2316 = vmatpush3.bf16.msra.mxu0 %v3157_v11  ;;  %2331 = vmatprep.mubr.msk.bf16.mxu0 %vm2722_vm0, %v2721_v0 }
 0x708   :  { %2317 = vmatprep.subr.bf16.mxu0 %v2721_v0 }
 0x70b   :  { %2318 = vmatpush3.bf16.msra.mxu0 %v3160_v43 }
 0x70c   :  { %2319 = vmatprep.subr.bf16.mxu0 %v2721_v0 }
 0x70f   :  { %2320 = vmatpush3.bf16.msra.mxu0 %v3170_v14 }
 0x710   :  { %2321 = vmatprep.subr.bf16.mxu0 %v2721_v0 }
 0x713   :  { %v1220_v36 = vpop.f32.mrf.mxu1  ;;  %2322 = vmatpush3.bf16.msra.mxu0 %v3176_v18 }
 0x714   :  { %v1226_v37 = vadd.f32 %v1220_v36, %v506_v45  ;;  %2323 = vmatprep.subr.bf16.mxu0 %v2721_v0 }
 0x715   :  { %v2313_v38 = vpop.f32.mrf.mxu1 }
 0x716   :  { %2547 = vtanh.f32 %v1226_v37  ;;  %v2526_v37 = vld [vmem:[#allocation13 + $0x20] sm:$0xff]   ;;  %v2527_v38 = vld [vmem:[#allocation13 + $0x18] sm:$0xff]  }
 0x717   :  { %v1223_v40 = vpop.f32.mrf.mxu1  ;;  %2324 = vmatpush3.bf16.msra.mxu0 %v3182_v19 }
 0x718   :  { %2325 = vmatprep.subr.bf16.mxu0 %v2721_v0  ;;  %v2528_v40 = vld [vmem:[#allocation13 + $0x10] sm:$0xff]  }
 0x719   :  { %v2314_v41 = vpop.f32.mrf.mxu1 }
 0x71a   :  { %v2530_v41 = vld [vmem:[#allocation13] sm:$0xff]  }
 0x71b   :  { %2326 = vmatpush3.bf16.msra.mxu0 %v3188_v20 }
 0x71c   :  { %2327 = vmatprep.subr.bf16.mxu0 %v2721_v0 }
 0x71f   :  { %2328 = vmatpush3.bf16.msra.mxu0 %v3194_v22 }
 0x720   :  { %2329 = vmatprep.subr.bf16.mxu0 %v2721_v0 }
 0x723   :  { %v2548_v48 = vpop.eup %2547  ;;  %2330 = vmatpush3.bf16.msra.mxu0 %v3200_v23 }
 0x724   :  { %v1229_v42 = vpack.c.bf16 %v2548_v48, %v2548_v48  ;;  %2355 = vmatprep.subr.bf16.mxu0 %v2721_v0 }
 0x726   :  { %2332 = vmatmul.mubr.bf16.vlgmr.msra.gmra.mxu0 %v1229_v42 }
 0x727   :  { %2356 = vmatpush3.bf16.msra.mxu0 %v3157_v11  ;;  %2371 = vmatprep.mubr.msk.bf16.mxu0 %vm2722_vm0, %v2721_v0 }
 0x728   :  { %2357 = vmatprep.subr.bf16.mxu0 %v2721_v0 }
 0x72b   :  { %2358 = vmatpush3.bf16.msra.mxu0 %v3160_v43 }
 0x72c   :  { %2359 = vmatprep.subr.bf16.mxu0 %v2721_v0 }
 0x72f   :  { %2360 = vmatpush3.bf16.msra.mxu0 %v3170_v14 }
 0x730   :  { %2361 = vmatprep.subr.bf16.mxu0 %v2721_v0 }
 0x733   :  { %2362 = vmatpush3.bf16.msra.mxu0 %v3176_v18 }
 0x734   :  { %2363 = vmatprep.subr.bf16.mxu0 %v2721_v0 }
 0x737   :  { %2364 = vmatpush3.bf16.msra.mxu0 %v3182_v19 }
 0x738   :  { %2365 = vmatprep.subr.bf16.mxu0 %v2721_v0 }
 0x73b   :  { %2366 = vmatpush3.bf16.msra.mxu0 %v3188_v20 }
 0x73c   :  { %2367 = vmatprep.subr.bf16.mxu0 %v2721_v0 }
 0x73f   :  { %2368 = vmatpush3.bf16.msra.mxu0 %v3194_v22 }
 0x740   :  { %2369 = vmatprep.subr.bf16.mxu0 %v2721_v0 }
 0x743   :  { %2370 = vmatpush3.bf16.msra.mxu0 %v3200_v23 }
 0x744   :  { %2395 = vmatprep.subr.bf16.mxu0 %v2721_v0 }
 0x7c6   :  { %v3275_v47 = vpop.f32.mrf.mxu0 }
 0x7c7   :  { %v1114_v48 = vadd.f32 %v3241_v32, %v3275_v47 }
 0x7c8   :  { %v2293_v49 = vpop.f32.mrf.mxu0 }
 0x7ca   :  { %v1116_v50 = vpop.f32.mrf.mxu0 }
 0x7cc   :  { %v2294_v51 = vpop.f32.mrf.mxu0 }
 0x7e6   :  { %v1264_v53 = vpop.f32.mrf.mxu0 }
 0x7e7   :  { %v1270_v54 = vadd.f32 %v1264_v53, %v592_v52 }
 0x7e8   :  { %v2333_v44 = vpop.f32.mrf.mxu0 }
 0x7e9   :  { %2549 = vtanh.f32 %v1270_v54  ;;  %v1705_v44 = vld [vmem:[%s3385_s8] ss:$0 sm:$0xff] }
 0x7ea   :  { %v1267_v56 = vpop.f32.mrf.mxu0 }
 0x7ec   :  { %v2334_v57 = vpop.f32.mrf.mxu0 }
 0x7f6   :  { %v2550_v58 = vpop.eup %2549 }
 0x7f7   :  { %v1273_v59 = vpack.c.bf16 %v2550_v58, %v2550_v58 }
 0x7f9   :  { %2352 = vmatmul.mubr.bf16.vlgmr.msra.gmra.mxu1 %v1273_v59 }
 0x7fa   :  { %2376 = vmatpush3.bf16.msra.mxu1 %v3157_v11  ;;  %2391 = vmatprep.mubr.msk.bf16.mxu1 %vm2722_vm0, %v2721_v0 }
 0x7fb   :  { %2377 = vmatprep.subr.bf16.mxu1 %v2721_v0 }
 0x7fe   :  { %2378 = vmatpush3.bf16.msra.mxu1 %v3160_v43 }
 0x7ff   :  { %2379 = vmatprep.subr.bf16.mxu1 %v2721_v0 }
 0x802   :  { %2380 = vmatpush3.bf16.msra.mxu1 %v3170_v14 }
 0x803   :  { %2381 = vmatprep.subr.bf16.mxu1 %v2721_v0 }
 0x806   :  { %2382 = vmatpush3.bf16.msra.mxu1 %v3176_v18 }
 0x807   :  { %2383 = vmatprep.subr.bf16.mxu1 %v2721_v0 }
 0x80a   :  { %2384 = vmatpush3.bf16.msra.mxu1 %v3182_v19 }
 0x80b   :  { %2385 = vmatprep.subr.bf16.mxu1 %v2721_v0 }
 0x80e   :  { %2386 = vmatpush3.bf16.msra.mxu1 %v3188_v20 }
 0x80f   :  { %2387 = vmatprep.subr.bf16.mxu1 %v2721_v0 }
 0x812   :  { %2388 = vmatpush3.bf16.msra.mxu1 %v3194_v22 }
 0x813   :  { %2389 = vmatprep.subr.bf16.mxu1 %v2721_v0 }
 0x816   :  { %2390 = vmatpush3.bf16.msra.mxu1 %v3200_v23 }
 0x817   :  { %2415 = vmatprep.subr.bf16.mxu1 %v2721_v0 }
 0x8b9   :  { %v1308_v61 = vpop.f32.mrf.mxu1 }
 0x8ba   :  { %v1314_v62 = vadd.f32 %v1308_v61, %v679_v60 }
 0x8bb   :  { %v2353_v63 = vpop.f32.mrf.mxu1 }
 0x8bc   :  { %2551 = vtanh.f32 %v1314_v62 }
 0x8bd   :  { %v1311_v1 = vpop.f32.mrf.mxu1 }
 0x8bf   :  { %v2354_v3 = vpop.f32.mrf.mxu1 }
 0x8c9   :  { %v2552_v5 = vpop.eup %2551 }
 0x8ca   :  { %v1317_v2 = vpack.c.bf16 %v2552_v5, %v2552_v5 }
 0x8cc   :  { %2372 = vmatmul.mubr.bf16.vlgmr.msra.gmra.mxu0 %v1317_v2 }
 0x8cd   :  { %2396 = vmatpush3.bf16.msra.mxu0 %v3157_v11  ;;  %2411 = vmatprep.mubr.msk.bf16.mxu0 %vm2722_vm0, %v2721_v0 }
 0x8ce   :  { %2397 = vmatprep.subr.bf16.mxu0 %v2721_v0 }
 0x8d1   :  { %2398 = vmatpush3.bf16.msra.mxu0 %v3160_v43 }
 0x8d2   :  { %2399 = vmatprep.subr.bf16.mxu0 %v2721_v0 }
 0x8d5   :  { %2400 = vmatpush3.bf16.msra.mxu0 %v3170_v14 }
 0x8d6   :  { %2401 = vmatprep.subr.bf16.mxu0 %v2721_v0 }
 0x8d9   :  { %2402 = vmatpush3.bf16.msra.mxu0 %v3176_v18 }
 0x8da   :  { %2403 = vmatprep.subr.bf16.mxu0 %v2721_v0 }
 0x8dd   :  { %2404 = vmatpush3.bf16.msra.mxu0 %v3182_v19 }
 0x8de   :  { %2405 = vmatprep.subr.bf16.mxu0 %v2721_v0 }
 0x8e1   :  { %2406 = vmatpush3.bf16.msra.mxu0 %v3188_v20 }
 0x8e2   :  { %2407 = vmatprep.subr.bf16.mxu0 %v2721_v0 }
 0x8e5   :  { %2408 = vmatpush3.bf16.msra.mxu0 %v3194_v22 }
 0x8e6   :  { %2409 = vmatprep.subr.bf16.mxu0 %v2721_v0 }
 0x8e9   :  { %2410 = vmatpush3.bf16.msra.mxu0 %v3200_v23 }
 0x8ea   :  { %2435 = vmatprep.subr.bf16.mxu0 %v2721_v0 }
 0x98c   :  { %v1352_v6 = vpop.f32.mrf.mxu0 }
 0x98d   :  { %v1358_v8 = vadd.f32 %v1352_v6, %v766_v16 }
 0x98e   :  { %v2373_v10 = vpop.f32.mrf.mxu0 }
 0x98f   :  { %2553 = vtanh.f32 %v1358_v8 }
 0x990   :  { %v1355_v13 = vpop.f32.mrf.mxu0 }
 0x992   :  { %v2374_v15 = vpop.f32.mrf.mxu0 }
 0x99c   :  { %v2554_v46 = vpop.eup %2553 }
 0x99d   :  { %v1361_v7 = vpack.c.bf16 %v2554_v46, %v2554_v46 }
 0x99f   :  { %2392 = vmatmul.mubr.bf16.vlgmr.msra.gmra.mxu1 %v1361_v7 }
 0x9a0   :  { %2416 = vmatpush3.bf16.msra.mxu1 %v3157_v11  ;;  %2431 = vmatprep.mubr.msk.bf16.mxu1 %vm2722_vm0, %v2721_v0 }
 0x9a1   :  { %2417 = vmatprep.subr.bf16.mxu1 %v2721_v0 }
 0x9a4   :  { %2418 = vmatpush3.bf16.msra.mxu1 %v3160_v43 }
 0x9a5   :  { %2419 = vmatprep.subr.bf16.mxu1 %v2721_v0 }
 0x9a8   :  { %2420 = vmatpush3.bf16.msra.mxu1 %v3170_v14 }
 0x9a9   :  { %2421 = vmatprep.subr.bf16.mxu1 %v2721_v0 }
 0x9ac   :  { %2422 = vmatpush3.bf16.msra.mxu1 %v3176_v18 }
 0x9ad   :  { %2423 = vmatprep.subr.bf16.mxu1 %v2721_v0 }
 0x9b0   :  { %2424 = vmatpush3.bf16.msra.mxu1 %v3182_v19 }
 0x9b1   :  { %2425 = vmatprep.subr.bf16.mxu1 %v2721_v0 }
 0x9b4   :  { %2426 = vmatpush3.bf16.msra.mxu1 %v3188_v20 }
 0x9b5   :  { %2427 = vmatprep.subr.bf16.mxu1 %v2721_v0 }
 0x9b8   :  { %2428 = vmatpush3.bf16.msra.mxu1 %v3194_v22 }
 0x9b9   :  { %2429 = vmatprep.subr.bf16.mxu1 %v2721_v0 }
 0x9bc   :  { %2430 = vmatpush3.bf16.msra.mxu1 %v3200_v23 }
 0x9bd   :  { %2455 = vmatprep.subr.bf16.mxu1 %v2721_v0 }
 0xa5f   :  { %v1396_v17 = vpop.f32.mrf.mxu1 }
 0xa60   :  { %v1402_v9 = vadd.f32 %v1396_v17, %v853_v39 }
 0xa61   :  { %v2393_v12 = vpop.f32.mrf.mxu1 }
 0xa62   :  { %2555 = vtanh.f32 %v1402_v9 }
 0xa63   :  { %v1399_v21 = vpop.f32.mrf.mxu1 }
 0xa65   :  { %v2394_v25 = vpop.f32.mrf.mxu1 }
 0xa6f   :  { %v2556_v28 = vpop.eup %2555 }
 0xa70   :  { %v1405_v29 = vpack.c.bf16 %v2556_v28, %v2556_v28 }
 0xa72   :  { %2412 = vmatmul.mubr.bf16.vlgmr.msra.gmra.mxu0 %v1405_v29 }
 0xa73   :  { %2436 = vmatpush3.bf16.msra.mxu0 %v3157_v11  ;;  %2451 = vmatprep.mubr.msk.bf16.mxu0 %vm2722_vm0, %v2721_v0 }
 0xa74   :  { %2437 = vmatprep.subr.bf16.mxu0 %v2721_v0 }
 0xa77   :  { %2438 = vmatpush3.bf16.msra.mxu0 %v3160_v43 }
 0xa78   :  { %2439 = vmatprep.subr.bf16.mxu0 %v2721_v0 }
 0xa7b   :  { %2440 = vmatpush3.bf16.msra.mxu0 %v3170_v14 }
 0xa7c   :  { %2441 = vmatprep.subr.bf16.mxu0 %v2721_v0 }
 0xa7f   :  { %2442 = vmatpush3.bf16.msra.mxu0 %v3176_v18 }
 0xa80   :  { %2443 = vmatprep.subr.bf16.mxu0 %v2721_v0 }
 0xa83   :  { %2444 = vmatpush3.bf16.msra.mxu0 %v3182_v19 }
 0xa84   :  { %2445 = vmatprep.subr.bf16.mxu0 %v2721_v0 }
 0xa87   :  { %2446 = vmatpush3.bf16.msra.mxu0 %v3188_v20  ;;  %v2523_v20 = vld [vmem:[#allocation13 + $0x38] sm:$0xff]  }
 0xa88   :  { %2447 = vmatprep.subr.bf16.mxu0 %v2721_v0 }
 0xa8b   :  { %2448 = vmatpush3.bf16.msra.mxu0 %v3194_v22  ;;  %v2524_v22 = vld [vmem:[#allocation13 + $0x30] sm:$0xff]  }
 0xa8c   :  { %2449 = vmatprep.subr.bf16.mxu0 %v2721_v0 }
 0xa8f   :  { %2450 = vmatpush3.bf16.msra.mxu0 %v3200_v23  ;;  %v2525_v23 = vld [vmem:[#allocation13 + $0x28] sm:$0xff]  }
 0xb32   :  { %v1440_v11 = vpop.f32.mrf.mxu0 }
 0xb33   :  { %v1446_v43 = vadd.f32 %v1440_v11, %v940_v55 }
 0xb34   :  { %v2413_v14 = vpop.f32.mrf.mxu0 }
 0xb35   :  { %2557 = vtanh.f32 %v1446_v43 }
 0xb36   :  { %v1443_v18 = vpop.f32.mrf.mxu0 }
 0xb38   :  { %v2414_v19 = vpop.f32.mrf.mxu0 }
 0xb42   :  { %v2558_v26 = vpop.eup %2557 }
 0xb43   :  { %v1449_v27 = vpack.c.bf16 %v2558_v26, %v2558_v26 }
 0xb45   :  { %2432 = vmatmul.mubr.bf16.vlgmr.msra.gmra.mxu1 %v1449_v27 }
 0xb46   :  { %2471 = vmatprep.mubr.msk.bf16.mxu1 %vm2722_vm0, %v2721_v0  ;;  %2456 = vmatpush3.bf16.msra.mxu1 %v2523_v20 }
 0xb47   :  { %2457 = vmatprep.subr.bf16.mxu1 %v2721_v0 }
 0xb4a   :  { %2458 = vmatpush3.bf16.msra.mxu1 %v2524_v22 }
 0xb4b   :  { %2459 = vmatprep.subr.bf16.mxu1 %v2721_v0 }
 0xb4e   :  { %2460 = vmatpush3.bf16.msra.mxu1 %v2525_v23 }
 0xb4f   :  { %2461 = vmatprep.subr.bf16.mxu1 %v2721_v0 }
 0xb52   :  { %2462 = vmatpush3.bf16.msra.mxu1 %v2526_v37 }
 0xb53   :  { %2463 = vmatprep.subr.bf16.mxu1 %v2721_v0 }
 0xb56   :  { %2464 = vmatpush3.bf16.msra.mxu1 %v2527_v38 }
 0xb57   :  { %2465 = vmatprep.subr.bf16.mxu1 %v2721_v0 }
 0xb5a   :  { %2466 = vmatpush3.bf16.msra.mxu1 %v2528_v40 }
 0xb5b   :  { %2467 = vmatprep.subr.bf16.mxu1 %v2721_v0 }
 0xb5e   :  { %2468 = vmatpush3.bf16.msra.mxu1 %v2529_v24 }
 0xb5f   :  { %2469 = vmatprep.subr.bf16.mxu1 %v2721_v0 }
 0xb62   :  { %2470 = vmatpush3.bf16.msra.mxu1 %v2530_v41 }
 0xc05   :  { %v1484_v30 = vpop.f32.mrf.mxu1 }
 0xc06   :  { %v1490_v31 = vadd.f32 %v1484_v30, %v1027_v4 }
 0xc07   :  { %v2433_v33 = vpop.f32.mrf.mxu1 }
 0xc08   :  { %2559 = vtanh.f32 %v1490_v31 }
 0xc09   :  { %v1487_v34 = vpop.f32.mrf.mxu1 }
 0xc0b   :  { %v2434_v35 = vpop.f32.mrf.mxu1 }
 0xc15   :  { %v2560_v45 = vpop.eup %2559 }
 0xc16   :  { %v1493_v36 = vpack.c.bf16 %v2560_v45, %v2560_v45 }
 0xc18   :  { %2452 = vmatmul.mubr.bf16.vlgmr.msra.gmra.mxu0 %v1493_v36 }
 0xcd8   :  { %v1528_v42 = vpop.f32.mrf.mxu0 }
 0xcd9   :  { %v1534_v49 = vadd.f32 %v1528_v42, %v1114_v48 }
 0xcda   :  { %v2453_v50 = vpop.f32.mrf.mxu0 }
 0xcdb   :  { %2561 = vtanh.f32 %v1534_v49 }
 0xcdc   :  { %v1531_v51 = vpop.f32.mrf.mxu0 }
 0xcde   :  { %v2454_v52 = vpop.f32.mrf.mxu0 }
 0xce8   :  { %v2562_v53 = vpop.eup %2561 }
 0xce9   :  { %v1536_v54 = vpack.c.bf16 %v2562_v53, %v2562_v53 }
 0xceb   :  { %2472 = vmatmul.mubr.bf16.vlgmr.msra.gmra.mxu1 %v1536_v54 }
 0xdab   :  { %v1642_v0 = vpop.f32.mrf.mxu1 }
 0xdac   :  { %v1643_v56 = vadd.f32 %v1705_v44, %v1642_v0 }
 0xdad   :  { %v2473_v57 = vpop.f32.mrf.mxu1 }
 0xdae   :  { %1648 = vst [vmem:[#allocation15] sm:$0xff] %v1643_v56 }
 0xdaf   :  { %v1645_v32 = vpop.f32.mrf.mxu1 }
 0xdb0   :  { %2694 = shalt.err (!%p2691_p6)
}
 0xdb1   :  { %1658 = dma.vmem_to_hbm [thread:$0]  %s1656_s19, 128, %s3386_s9, [#allocation6]   ;;  %v2474_v47 = vpop.f32.mrf.mxu1 }
 0xdb2   :  { %2711 = dma.done.wait [#allocation6], 128  }
 0xdb3   :  { %2712 = vsyncadd [#allocation6], 4294967168 }
 0xdb4   :  { %1662 = vsyncpa [#allocation5], 1 }
 0xdb5   :  { %1663 = vsyncpa [#allocation8], 1 }
 0xdb6   :  { %1664 = vsyncpa [#allocation11], 1 }
 0xdb7   :  { %1665 = vsyncpa [#allocation14], 1 }
 0xdb8   :  { %1666 = vsyncpa [#allocation6], 1 }

</bundles_post_ra>
